<compile_context>
chip_gen: v7x
topology: tpu7x:2x2x1
jax: 0.10.0
libtpu: 0.0.40
codegen_flags: <defaults>
</compile_context>

<pallas_src>
import jax
import jax.numpy as jnp
import numpy as np
from jax import lax
from jax.experimental import pallas as pl
from jax.experimental.pallas import tpu as pltpu

KSIZE = 11                 # avg_pool2d kernel_size=11, stride=1
PAD = (KSIZE - 1) // 2     # replicate pad of 5 on each spatial side
LANE = 128
SUBLANE = 8


def _band_matrix(n):
    """(n, n) matrix M with M[i, r] = number of taps of the 11-wide box centred
    at output i (over the replicate-padded axis) that land on source index r."""
    src = np.clip(np.arange(-PAD, n + PAD), 0, n - 1)
    m = np.zeros((n, n), np.float32)
    for i in range(n):
        np.add.at(m[i], src[i:i + KSIZE], 1.0)
    return m


def _box_operator_t(h, w, hw_pad):
    """Transposed dense 2-D box-sum operator, zero-embedded in (hw_pad, hw_pad).

    box_sum[b, i*w + j] = sum_{r,c} Mh[i,r] * Mw[j,c] * x[b, r*w + c]
                        = (x_flat @ K.T)[b, i*w + j],   K = kron(Mh, Mw),
    with the replicate padding folded into the boundary weights of Mh / Mw.
    """
    k = np.kron(_band_matrix(h), _band_matrix(w))          # (h*w, h*w)
    kt = np.zeros((hw_pad, hw_pad), np.float32)
    kt[:h * w, :h * w] = k.T
    return jnp.asarray(kt)


def _std_weighted_loss_kernel(pred_ref, tgt_ref, kt_ref, out_ref):
    # pred_ref, tgt_ref : (1, bc_tile, hw_pad)   VMEM (pipelined blocks)
    # kt_ref            : (hw_pad, hw_pad)       VMEM (resident box operator^T)
    # out_ref           : (1, 1, hw_pad)         VMEM (lane-dense partial sums)
    tgt = tgt_ref[0].astype(jnp.float32)      # reused for box filter AND L1
    pred = pred_ref[0].astype(jnp.float32)
    kt = kt_ref[...]

    inv = jnp.float32(1.0 / (KSIZE * KSIZE))
    box = jnp.dot(tgt, kt, preferred_element_type=jnp.float32,
                  precision=lax.Precision.HIGHEST)
    box2 = jnp.dot(tgt * tgt, kt, preferred_element_type=jnp.float32,
                   precision=lax.Precision.HIGHEST)

    mean_img = box * inv                       # avg_pool2d(padded)
    mean_sq = box2 * inv                       # avg_pool2d(padded ** 2)
    var = mean_sq - mean_img * mean_img
    std = jnp.sqrt(jnp.maximum(var, 0.0))
    weights = 1.0 + jnp.minimum(std, jnp.float32(0.4)) * jnp.float32(5.0)

    l1 = jnp.abs(pred - tgt)
    prod = l1 * weights
    # Per-lane partial sums: reduce only over the sublane (bc) axis in-kernel;
    # the cross-lane reduction is done by the wrapper.
    row = jnp.sum(prod, axis=0, keepdims=True)             # (1, hw_pad)
    out_ref[...] = row.reshape(1, 1, row.shape[-1])


def _plan_blocks(bc, hw_pad, budget_bytes=24 * 1024 * 1024):
    """Choose (n_blocks, bc_tile): at least 2 grid blocks (v7x megacore),
    bc_tile a multiple of 8 sublanes, and a VMEM footprint (double-buffered
    inputs + elementwise temporaries + resident operator) within budget."""
    per_row = hw_pad * 4 * (2 * 2 + 10)   # dbl-buffered pred/tgt + ~10 f32 temps
    fixed = 2 * hw_pad * hw_pad * 4 + 2 * hw_pad * 4
    avail = max(budget_bytes - fixed, per_row * SUBLANE)
    max_tile = max(SUBLANE, (avail // per_row) // SUBLANE * SUBLANE)
    n_blocks = max(2, pl.cdiv(bc, max_tile))
    bc_tile = pl.cdiv(pl.cdiv(bc, n_blocks), SUBLANE) * SUBLANE
    return n_blocks, bc_tile


def std_weighted_loss(predict, target):
    """Pallas implementation of StdWeightedLoss.forward (returns scalar f32)."""
    b, c, h, w = predict.shape
    bc = b * c
    hw = h * w
    hw_pad = pl.cdiv(hw, LANE) * LANE

    # TODO(synk): for large images (h*w >~ 2048) the dense (h*w, h*w) box
    # operator no longer fits comfortably in VMEM; switch to separable
    # (h,h)/(w,w) band-matrix matmuls in that regime.
    if hw_pad > 2048:
        raise NotImplementedError("dense box operator is sized for small spatial dims")

    n_blocks, bc_tile = _plan_blocks(bc, hw_pad)
    bc_pad = n_blocks * bc_tile

    def prep(x):
        xf = x.reshape(bc, hw).astype(jnp.float32)
        # Zero padding is exact: padded rows/cols have l1 == 0, so they add
        # nothing to the weighted sum; we divide by the TRUE count below.
        xf = jnp.pad(xf, ((0, bc_pad - bc), (0, hw_pad - hw)))
        return xf.reshape(n_blocks, bc_tile, hw_pad)

    pred_p = prep(predict)
    tgt_p = prep(target)
    kt = _box_operator_t(h, w, hw_pad)

    partials = pl.pallas_call(
        _std_weighted_loss_kernel,
        out_shape=jax.ShapeDtypeStruct((n_blocks, 1, hw_pad), jnp.float32),
        grid_spec=pltpu.PrefetchScalarGridSpec(
            num_scalar_prefetch=0,
            grid=(n_blocks,),
            in_specs=[
                pl.BlockSpec((1, bc_tile, hw_pad), lambda i: (i, 0, 0)),
                pl.BlockSpec((1, bc_tile, hw_pad), lambda i: (i, 0, 0)),
                pl.BlockSpec((hw_pad, hw_pad), lambda i: (0, 0)),
            ],
            out_specs=pl.BlockSpec((1, 1, hw_pad), lambda i: (i, 0, 0)),
        ),
        compiler_params=pltpu.CompilerParams(
            dimension_semantics=("parallel",),
            vmem_limit_bytes=48 * 1024 * 1024,
        ),
    )(pred_p, tgt_p, kt)

    total = jnp.sum(partials)
    return total / jnp.float32(bc * h * w)


def _reference_loss(predict, target):
    """Pure-JAX reference (mirrors the PyTorch module) for a correctness check."""
    tgt_pad = jnp.pad(target, ((0, 0), (0, 0), (PAD, PAD), (PAD, PAD)),
                      mode="edge")

    def box(x):
        n, ch, hp, wp = x.shape
        h, w = hp - (KSIZE - 1), wp - (KSIZE - 1)
        acc = jnp.zeros((n, ch, h, w), jnp.float32)
        for dy in range(KSIZE):
            for dx in range(KSIZE):
                acc = acc + x[:, :, dy:dy + h, dx:dx + w]
        return acc / float(KSIZE * KSIZE)

    mean_img = box(tgt_pad)
    mean_sq = box(tgt_pad * tgt_pad)
    var = mean_sq - mean_img * mean_img
    std = jnp.sqrt(jnp.maximum(var, 0.0))
    weights = 1.0 + jnp.minimum(std, 0.4) / 0.2
    l1 = jnp.abs(predict - target)
    return jnp.mean(l1 * weights)


if __name__ == "__main__":
    key = jax.random.PRNGKey(0)
    k1, k2 = jax.random.split(key)
    B, C, H, W = 2, 4, 16, 16
    predict = jax.random.uniform(k1, (B, C, H, W), dtype=jnp.float32)
    target = jax.random.uniform(k2, (B, C, H, W), dtype=jnp.float32)

    loss = std_weighted_loss(predict, target)
    loss = jax.block_until_ready(loss)

    ref = _reference_loss(predict, target)
    assert jnp.allclose(loss, ref, rtol=1e-5, atol=1e-5), (loss, ref)
    print("KERNEL_OK")
</pallas_src>

<mosaic_0001>
module attributes {stable_mosaic.version = 11 : i64} {
  func.func @_std_weighted_loss_kernel(%arg0: i32, %arg1: memref<1x8x256xf32, #tpu.memory_space<vmem>>, %arg2: memref<1x8x256xf32, #tpu.memory_space<vmem>>, %arg3: memref<256x256xf32, #tpu.memory_space<vmem>>, %arg4: memref<1x1x256xf32, #tpu.memory_space<vmem>>) attributes {dimension_semantics = [#tpu.dimension_semantics<parallel>], iteration_bounds = array<i64: 2>, scalar_prefetch = 0 : i64, scratch_operands = 0 : i64, tpu.core_type = #tpu.core_type<tc>, window_params = [{transform_indices = @transform_0, window_bounds = array<i64: 1, 8, 256>}, {transform_indices = @transform_1, window_bounds = array<i64: 1, 8, 256>}, {pipeline_mode = #tpu.pipeline_mode<synchronous>, transform_indices = @transform_2, window_bounds = array<i64: 256, 256>}, {transform_indices = @transform_3, window_bounds = array<i64: 1, 1, 256>}]} {
    %c0 = arith.constant 0 : index
    %c0_0 = arith.constant 0 : index
    %c0_1 = arith.constant 0 : index
    %0 = vector.load %arg2[%c0, %c0_0, %c0_1] : memref<1x8x256xf32, #tpu.memory_space<vmem>>, vector<1x8x256xf32>
    %1 = vector.shape_cast %0 : vector<1x8x256xf32> to vector<8x256xf32>
    %c0_2 = arith.constant 0 : index
    %c0_3 = arith.constant 0 : index
    %c0_4 = arith.constant 0 : index
    %2 = vector.load %arg1[%c0_2, %c0_3, %c0_4] : memref<1x8x256xf32, #tpu.memory_space<vmem>>, vector<1x8x256xf32>
    %3 = vector.shape_cast %2 : vector<1x8x256xf32> to vector<8x256xf32>
    %c0_5 = arith.constant 0 : index
    %c0_6 = arith.constant 0 : index
    %4 = vector.load %arg3[%c0_5, %c0_6] : memref<256x256xf32, #tpu.memory_space<vmem>>, vector<256x256xf32>
    %cst = arith.constant dense<0.000000e+00> : vector<8x256xf32>
    %5 = tpu.matmul %1, %4, %cst {dimension_numbers = #tpu.dot_dimension_numbers<[1], [0], [0], [1], [0, 0, 1, 1], [], []>, precision = #tpu.contract_precision<fp32>} : vector<8x256xf32>, vector<256x256xf32>, vector<8x256xf32> -> vector<8x256xf32>
    %6 = arith.mulf %1, %1 : vector<8x256xf32>
    %cst_7 = arith.constant dense<0.000000e+00> : vector<8x256xf32>
    %7 = tpu.matmul %6, %4, %cst_7 {dimension_numbers = #tpu.dot_dimension_numbers<[1], [0], [0], [1], [0, 0, 1, 1], [], []>, precision = #tpu.contract_precision<fp32>} : vector<8x256xf32>, vector<256x256xf32>, vector<8x256xf32> -> vector<8x256xf32>
    %cst_8 = arith.constant 0.00826446246 : f32
    %8 = vector.broadcast %cst_8 : f32 to vector<8x256xf32>
    %9 = arith.mulf %5, %8 : vector<8x256xf32>
    %cst_9 = arith.constant 0.00826446246 : f32
    %10 = vector.broadcast %cst_9 : f32 to vector<8x256xf32>
    %11 = arith.mulf %7, %10 : vector<8x256xf32>
    %12 = arith.mulf %9, %9 : vector<8x256xf32>
    %13 = arith.subf %11, %12 : vector<8x256xf32>
    %cst_10 = arith.constant 0.000000e+00 : f32
    %14 = vector.broadcast %cst_10 : f32 to vector<8x256xf32>
    %15 = arith.maximumf %13, %14 : vector<8x256xf32>
    %16 = math.sqrt %15 : vector<8x256xf32>
    %cst_11 = arith.constant 4.000000e-01 : f32
    %17 = vector.broadcast %cst_11 : f32 to vector<8x256xf32>
    %18 = arith.minimumf %16, %17 : vector<8x256xf32>
    %cst_12 = arith.constant 5.000000e+00 : f32
    %19 = vector.broadcast %cst_12 : f32 to vector<8x256xf32>
    %20 = arith.mulf %18, %19 : vector<8x256xf32>
    %cst_13 = arith.constant 1.000000e+00 : f32
    %21 = vector.broadcast %cst_13 : f32 to vector<8x256xf32>
    %22 = arith.addf %21, %20 : vector<8x256xf32>
    %23 = arith.subf %3, %1 : vector<8x256xf32>
    %24 = math.absf %23 : vector<8x256xf32>
    %25 = arith.mulf %24, %22 : vector<8x256xf32>
    %cst_14 = arith.constant dense<0.000000e+00> : vector<256xf32>
    %26 = vector.multi_reduction <add>, %25, %cst_14 [0] : vector<8x256xf32> to vector<256xf32>
    %27 = vector.shape_cast %26 : vector<256xf32> to vector<1x256xf32>
    %28 = vector.shape_cast %27 : vector<1x256xf32> to vector<1x1x256xf32>
    %c0_15 = arith.constant 0 : index
    %c0_16 = arith.constant 0 : index
    %c0_17 = arith.constant 0 : index
    %29 = vector.load %arg4[%c0_15, %c0_16, %c0_17] : memref<1x1x256xf32, #tpu.memory_space<vmem>>, vector<1x1x256xf32>
    tpu.vector_store %arg4[%c0_15, %c0_16, %c0_17], %28 {strides = array<i32>} : memref<1x1x256xf32, #tpu.memory_space<vmem>>, vector<1x1x256xf32>,
    return
  }
  func.func @transform_0(%arg0: i32) -> (i32, i32, i32) {
    %c0_i32 = arith.constant 0 : i32
    %c0_i32_0 = arith.constant 0 : i32
    %c0_i32_1 = arith.constant 0 : i32
    return %arg0, %c0_i32, %c0_i32_0 : i32, i32, i32
  }
  func.func @transform_1(%arg0: i32) -> (i32, i32, i32) {
    %c0_i32 = arith.constant 0 : i32
    %c0_i32_0 = arith.constant 0 : i32
    %c0_i32_1 = arith.constant 0 : i32
    return %arg0, %c0_i32, %c0_i32_0 : i32, i32, i32
  }
  func.func @transform_2(%arg0: i32) -> (i32, i32) {
    %c0_i32 = arith.constant 0 : i32
    %c0_i32_0 = arith.constant 0 : i32
    %c0_i32_1 = arith.constant 0 : i32
    return %c0_i32, %c0_i32_0 : i32, i32
  }
  func.func @transform_3(%arg0: i32) -> (i32, i32, i32) {
    %c0_i32 = arith.constant 0 : i32
    %c0_i32_0 = arith.constant 0 : i32
    %c0_i32_1 = arith.constant 0 : i32
    return %arg0, %c0_i32, %c0_i32_0 : i32, i32, i32
  }
}

</mosaic_0001>

<bundles_post_ra>
// kernel: tpu_custom_call.1
= control target key start
LH: loop header
LB: loop body
LE: loop exit
PB: predicated region body
PF: predicated region fallthrough
CT: control target
= control target key end

     0   :  { %8 = vsyncpa [#allocation3], 0  ;;  %s6019_s0 = inlined_call_operand.hbm [shape: f32[2,8,256], index: 0, kind: input, shape index: {}]   ;;  %s6020_s1 = inlined_call_operand.hbm [shape: f32[2,8,256], index: 1, kind: input, shape index: {}]   ;;  %s6021_s2 = inlined_call_operand.hbm [shape: f32[256,256], index: 2, kind: input, shape index: {}]   ;;  %s6022_s3 = inlined_call_operand.hbm [shape: f32[2,1,256], index: 3, kind: output, shape index: {}]  }
   0x1   :  { %10 = vsyncpa [#allocation3 + $0x1], 0 }
   0x2   :  { %11 = vsyncpa [#allocation6], 0 }
   0x3   :  { %13 = vsyncpa [#allocation6 + $0x1], 0 }
   0x4   :  { %14 = vsyncpa [#allocation4], 0 }
   0x5   :  { %16 = vsyncpa [#allocation4 + $0x1], 0  ;;  %s4138_s12 = smov 0   ;;  %s4140_s13 = smov 0  }
   0x6   :  { %s4142_s14 = smov 0   ;;  %s4144_s15 = smov 0  }
   0x7 LB: > { %s4159_s16 = sadd.s32 4294967295, %s4109_s15   ;;  %s3065_s17 = sadd.s32 4294967294, %s4109_s15   ;;  %s4109_s15 = sphi %s4144_s15, %s6798_s15   ;;  %s4105_s14 = sphi %s4142_s14, %s6797_s14   ;;  %s4101_s13 = sphi %s4140_s13, %s6796_s13   ;;  %s4097_s12 = sphi %s4138_s12, %s6795_s12  }
   0x8   : > { %p42_p0 = scmp.ne.s32.totalorder %s4101_s13, %s4097_s12  ;;  %p6023_p1 = scmp.eq.s32.totalorder %s4159_s16, 0 }
   0x9   : > { %p119_p3 = scmp.eq.s32.totalorder %s3065_s17, 1  ;;  %p3066_p5 = scmp.ge.s32.totalorder %s4109_s15, 1 }
   0xa   : > { %p4168_p4 = por %p6023_p1, %p42_p0  ;;  %p126_p7 = scmp.lt.s32.totalorder %s4109_s15, 3 }
   0xb   : > { %p4173_p6 = por %p119_p3, %p42_p0  ;;  %s4111_s21 = smov [#allocation7]  }
   0xc   : > { %s6299_s18 = scalar_select %p4168_p4, 1, 0 }
   0xd   : > { %s6300_s19 = scalar_select %p4173_p6, 1, 0 }
   0xe   : > { %p4178_p8 = pnand %p3066_p5, %p126_p7  ;;  %s138_s22 = sshll.u32 %s4111_s21, 4  ;;  %s4182_s22 = int_to_ptr.vmem [resolvable:$true] %s138_s22 }
   0xf   : > { %s4194_s24 = sadd.s32 1, %s4109_s15   ;;  %s29_s25 = sadd.s32 1, %s4105_s14 }
  0x10   : > { %s6301_s20 = scalar_select %p4178_p8, 1, 0 }
  0x11   : > { %p3886_p9 = pneg %p4178_p8  ;;  %s26_s26 = ssub.s32 %s4109_s15, %s4194_s24 }
  0x12   : > { %s3947_s29 = scalar_lea.hbm %s6021_s2, 8192 }
  0x13   : > { %p4189_p11 = pnand %p3886_p9, %p6023_p1  ;;  %p3948_p12 = scmp.ne.s32.totalorder %s6021_s2, %s3947_s29 }
  0x14   : > { %p3954_p5 = scmp.lt.u32.totalorder %s3947_s29, %s6021_s2 }
  0x15   : > { %p3949_p13 = pneg %p4189_p11 }
  0x17   : > { %p3950_p0 = pnand %p3949_p13, %p3948_p12 }
  0x19   : > { %p3951_p3 = pneg %p3950_p0 }
  0x1b   : > { %p3956_p7 = pnand %p3954_p5, %p3951_p3 }
  0x1d   : > { %3959 = shalt.err (!%p3956_p7)
}
  0x1e   : > { %s3960_s7 = scalar_lea.vmem %s4182_s22, 8192  ;;  %p3968_p2 = scmp.lt.s32.totalorder %s4182_s22, %s4182_s22 }
  0x1f   : > { %p3961_p9 = scmp.ne.s32.totalorder %s4182_s22, %s3960_s7  ;;  %p3969_p6 = scmp.lt.s32.totalorder %s3960_s7, %s3960_s7 }
  0x21   : > { %p3963_p10 = pnand %p3961_p9, %p3949_p13  ;;  %p3970_p4 = por %p3969_p6, %p3968_p2 }
  0x23   : > { %p3964_p1 = pneg %p3963_p10 }
  0x25   : > { %p3971_p8 = pnand %p3970_p4, %p3964_p1 }
  0x27   : > { %3974 = shalt.err (!%p3971_p8)
}
  0x28   : > { %s4112_s8 = smov 256   ;;  %s4113_s9 = smov 16  }
  0x29   : > { %3889 = dma.hbm_to_vmem [thread:$0]  (!%p4189_p11), %s6021_s2, 8192, %s4182_s22, [#allocation6], %s4112_s8, %s4112_s8, %s4113_s9  }
  0x2a   : > { %p27_p2 = scmp.eq.s32.totalorder %s26_s26, 0  ;;  %p36_p1 = scmp.ne.s32.totalorder %s4105_s14, %s4101_s13 }
  0x2b   : > { %p37_p4 = scmp.eq.s32.totalorder %s4109_s15, 0  ;;  %p3902_p6 = scmp.lt.s32.totalorder %s4109_s15, 2 }
  0x2c   : > { %s4225_s17 = scalar_select %p27_p2, %s4105_s14, %s29_s25  }
  0x2d   : > { %p38_p8 = por %p37_p4, %p36_p1  ;;  %p6303_p10 = scmp.eq.s32.totalorder %s4159_s16, 1 }
  0x2e   : > { %s152_s27 = sand.u32 1, %s4105_s14   ;;  %s3085_s28 = sshll.u32 %s4109_s15, 8 }
  0x2f   : > { %p4229_p12 = por %p6303_p10, %p36_p1  ;;  %s4235_s29 = sshll.u32 %s152_s27, 4 }
  0x30   : > { %s4240_s22 = scalar_lea.hbm %s6019_s0, %s3085_s28  ;;  %s156_s25 = scalar_lea.vmem [#allocation2], %s4235_s29 }
  0x31   : > { %s6304_s21 = scalar_select %p4229_p12, 1, 0 }
  0x32   : > { %s164_s26 = sshll.u32 %s156_s25, 4  ;;  %p4243_p11 = pnand %p3902_p6, %p38_p8  ;;  %s4247_s26 = int_to_ptr.vmem [resolvable:$true] %s164_s26 }
  0x33   : > { %s4252_s7 = scalar_lea.hbm %s6020_s1, %s3085_s28  ;;  %s153_s8 = scalar_lea.sflag [#allocation3], %s152_s27 }
  0x34   : > { %s3975_s9 = scalar_lea.hbm %s4240_s22, 256  ;;  %p3977_p0 = pneg %p4243_p11 }
  0x35   : > { %p3976_p13 = scmp.ne.s32.totalorder %s4240_s22, %s3975_s9  ;;  %s3980_s23 = scalar_lea.hbm %s6019_s0, 512 }
  0x36   : > { %p3981_p7 = scmp.lt.u32.totalorder %s4240_s22, %s6019_s0  ;;  %p3982_p9 = scmp.lt.u32.totalorder %s3980_s23, %s3975_s9 }
  0x37   : > { %p3978_p3 = pnand %p3977_p0, %p3976_p13  ;;  %p3984_p1 = scmp.lt.u32.totalorder %s3975_s9, %s4240_s22 }
  0x38   : > { %p3983_p2 = por %p3982_p9, %p3981_p7 }
  0x39   : > { %p3979_p5 = pneg %p3978_p3 }
  0x3a   : > { %p3985_p4 = por %p3984_p1, %p3983_p2 }
  0x3c   : > { %p3986_p6 = pnand %p3985_p4, %p3979_p5 }
  0x3e   : > { %3989 = shalt.err (!%p3986_p6)
}
  0x3f   : > { %s3990_s27 = scalar_lea.vmem %s4247_s26, 256  ;;  %s4114_s28 = smov [#allocation2]  }
  0x40   : > { %p3991_p8 = scmp.ne.s32.totalorder %s4247_s26, %s3990_s27  ;;  %s3995_s5 = sshll.u32 %s4114_s28, 4  ;;  %s3996_s5 = int_to_ptr.vmem [resolvable:$false] %s3995_s5 }
  0x41   : > { %s3997_s6 = scalar_lea.vmem %s3996_s5, 512  ;;  %p3998_p3 = scmp.lt.s32.totalorder %s4247_s26, %s3996_s5 }
  0x42   : > { %p3993_p10 = pnand %p3991_p8, %p3977_p0  ;;  %p3999_p7 = scmp.lt.s32.totalorder %s3997_s6, %s3990_s27 }
  0x44   : > { %p3994_p13 = pneg %p3993_p10  ;;  %p4000_p9 = por %p3999_p7, %p3998_p3 }
  0x46   : > { %p4001_p2 = pnand %p4000_p9, %p3994_p13 }
  0x48   : > { %4004 = shalt.err (!%p4001_p2)
}
  0x49   : > { %3893 = dma.hbm_to_vmem [thread:$0]  (!%p4243_p11), %s4240_s22, 256, %s4247_s26, %s153_s8  }
  0x4a   : > { %s171_s9 = sand.u32 1, %s4109_s15   ;;  %s175_s10 = scalar_lea.vmem [#allocation5], %s4235_s29 }
  0x4b   : > { %s183_s11 = sshll.u32 %s175_s10, 4  ;;  %s172_s23 = scalar_lea.sflag [#allocation6], %s171_s9  ;;  %s184_s11 = int_to_ptr.vmem [resolvable:$true] %s183_s11 }
  0x4c   : > { %s4005_s30 = scalar_lea.hbm %s4252_s7, 256  ;;  %s4010_s28 = scalar_lea.hbm %s6020_s1, 512 }
  0x4d   : > { %p4006_p5 = scmp.ne.s32.totalorder %s4252_s7, %s4005_s30  ;;  %p4011_p6 = scmp.lt.u32.totalorder %s4252_s7, %s6020_s1 }
  0x4e   : > { %p4012_p8 = scmp.lt.u32.totalorder %s4010_s28, %s4005_s30  ;;  %p4014_p13 = scmp.lt.u32.totalorder %s4005_s30, %s4252_s7 }
  0x4f   : > { %p4008_p1 = pnand %p4006_p5, %p3977_p0 }
  0x50   : > { %p4013_p10 = por %p4012_p8, %p4011_p6 }
  0x51   : > { %p4009_p4 = pneg %p4008_p1 }
  0x52   : > { %p4015_p3 = por %p4014_p13, %p4013_p10 }
  0x54   : > { %p4016_p7 = pnand %p4015_p3, %p4009_p4 }
  0x56   : > { %4019 = shalt.err (!%p4016_p7)
}
  0x57   : > { %s4020_s29 = scalar_lea.vmem %s184_s11, 256  ;;  %s4115_s22 = smov [#allocation5]  }
  0x58   : > { %p4021_p9 = scmp.ne.s32.totalorder %s184_s11, %s4020_s29  ;;  %s4025_s26 = sshll.u32 %s4115_s22, 4  ;;  %s4026_s26 = int_to_ptr.vmem [resolvable:$false] %s4025_s26 }
  0x59   : > { %s4027_s8 = scalar_lea.vmem %s4026_s26, 512  ;;  %p4028_p1 = scmp.lt.s32.totalorder %s184_s11, %s4026_s26 }
  0x5a   : > { %p4023_p2 = pnand %p4021_p9, %p3977_p0  ;;  %p4029_p12 = scmp.lt.s32.totalorder %s4027_s8, %s4020_s29 }
  0x5c   : > { %p4024_p5 = pneg %p4023_p2  ;;  %p4030_p6 = por %p4029_p12, %p4028_p1 }
  0x5e   : > { %p4031_p8 = pnand %p4030_p6, %p4024_p5 }
  0x60   : > { %4034 = shalt.err (!%p4031_p8)
}
  0x61   : > { %3896 = dma.hbm_to_vmem [thread:$0]  (!%p4243_p11), %s4252_s7, 256, %s184_s11, %s172_s23  }
  0x62   : > { %p6306_p4 = scmp.ne.s32.totalorder %s6301_s20, 0 }
  0x64   : > { %192 = sbr.rel (%p6306_p4) target bundleno = 797 (0x31d), region = 32 }
  0x6b   : > { %s4303_s9 = sand.u32 1, %s4101_s13   ;;  %p6307_p12 = scmp.ne.s32.totalorder %s6299_s18, 0 }
  0x6c   : > { %s3076_s10 = sshll.u32 %s4303_s9, 4  ;;  %s195_s30 = scalar_lea.sflag [#allocation3], %s4303_s9 }
  0x6d   : > { %s4307_s25 = scalar_lea.vmem [#allocation2], %s3076_s10 }
  0x6e   : > { %4080 = dma.done.wait (%p6307_p12), %s195_s30, 256  }
  0x6f   : > { %4082 = vsyncadd (%p6307_p12), %s195_s30, 4294967040  ;;  %s203_s4 = sand.u32 1, %s4159_s16   ;;  %s4314_s7 = scalar_lea.vmem [#allocation5], %s3076_s10 }
  0x70   : > { %s204_s20 = scalar_lea.sflag [#allocation6], %s203_s4 }
  0x71   : > { %4084 = dma.done.wait (%p6307_p12), %s204_s20, 256  }
  0x72   : > { %4086 = vsyncadd (%p6307_p12), %s204_s20, 4294967040  ;;  %p6308_p11 = scmp.eq.s32.totalorder %s4159_s16, 0 }
  0x74   : > { %4088 = dma.done.wait (%p6308_p11), [#allocation6], 8192   ;;  %p6309_p0 = pmov %p6308_p11 }
  0x75   : > { %v4324_v0 = vld [vmem:[#allocation7 + $0x8] sm:$0xff]  ;;  %v4326_v1 = vld [vmem:[#allocation7 + $0x18] sm:$0xff]  ;;  %v4328_v2 = vld [vmem:[#allocation7] sm:$0xff]  ;;  %s3079_s18 = sshll.u32 %s4303_s9, 1  ;;  %s3087_s11 = sshll.u32 %s4159_s16, 5 }
  0x76   : > { %4090 = vsyncadd (%p6309_p0), [#allocation6], 4294959104  ;;  %v6046_v3 = vand.u32 4294901760, %v4324_v0  ;;  %v6045_v4 = vand.u32 4294901760, %v4326_v1  ;;  %v4332_v5 = vld [vmem:[#allocation7 + $0x10] sm:$0xff]  ;;  %v6044_v6 = vand.u32 4294901760, %v4328_v2  ;;  %s5975_s6 = scalar_lea.hbm %s6022_s3, %s3087_s11 }
  0x77   : > { %v4335_v7 = vld [vmem:[#allocation7 + $0x28] sm:$0xff]  ;;  %v4337_v8 = vld [vmem:[#allocation7 + $0x38] sm:$0xff]  ;;  %v6043_v9 = vand.u32 4294901760, %v4332_v5  ;;  %v4342_v12 = vld [vmem:[#allocation7 + $0x20] sm:$0xff]  ;;  %s238_s23 = scalar_lea.vmem [#allocation8], %s3079_s18  ;;  %s2949_s29 = scalar_lea.sflag [#allocation4], %s4303_s9 }
  0x78   : > { %v6042_v10 = vand.u32 4294901760, %v4335_v7  ;;  %v6041_v11 = vand.u32 4294901760, %v4337_v8  ;;  %v4344_v13 = vld [vmem:[#allocation7 + $0x30] sm:$0xff]  ;;  %v4346_v14 = vld [vmem:[#allocation7 + $0x48] sm:$0xff]  ;;  %v4352_v15 = vpack.c.bf16 %v6045_v4, %v6046_v3  ;;  %v6038_v16 = vand.u32 4294901760, %v4342_v12  ;;  %v4356_v18 = vld [vmem:[#allocation7 + $0x58] sm:$0xff] }
  0x79   : > { %v6037_v17 = vand.u32 4294901760, %v4344_v13  ;;  %v6036_v19 = vand.u32 4294901760, %v4346_v14  ;;  %v4359_v20 = vld [vmem:[#allocation7 + $0x40] sm:$0xff]  ;;  %v4361_v21 = vld [vmem:[#allocation7 + $0x50] sm:$0xff]  ;;  %v4367_v22 = vpack.c.bf16 %v6043_v9, %v6044_v6  ;;  %v6035_v24 = vand.u32 4294901760, %v4356_v18  ;;  %v4376_v25 = vld [vmem:[#allocation7 + $0x68] sm:$0xff] }
  0x7a   : > { %6310 = vst [vmem:[#allocation13_spill] sm:$0xff] %v4352_v15  ;;  %v4373_v23 = vpack.c.bf16 %v6041_v11, %v6042_v10  ;;  %v4378_v26 = vld [vmem:[#allocation7 + $0x78] sm:$0xff]  ;;  %3089 = vmatprep.subr.bf16.mxu0 %v4352_v15  ;;  %3473 = vmatprep.subr.bf16.mxu1 %v4352_v15  ;;  %v6034_v28 = vand.u32 4294901760, %v4359_v20  ;;  %v6033_v29 = vand.u32 4294901760, %v4361_v21  ;;  %v6032_v31 = vand.u32 4294901760, %v4376_v25  ;;  %v4402_v33 = vld [vmem:[#allocation7 + $0x60] sm:$0xff] }
  0x7b   : > { %6311 = vst [vmem:[#allocation14_spill] sm:$0xff] %v4367_v22  ;;  %3091 = vmatpush1.bf16.msra.mxu0 %v4367_v22  ;;  %3475 = vmatpush1.bf16.msra.mxu1 %v4367_v22  ;;  %v4388_v27 = vpack.c.bf16 %v6037_v17, %v6038_v16  ;;  %v4398_v30 = vpack.c.bf16 %v6035_v24, %v6036_v19  ;;  %v6029_v32 = vand.u32 4294901760, %v4378_v26  ;;  %v4404_v34 = vld [vmem:[#allocation7 + $0x70] sm:$0xff]  ;;  %v4406_v35 = vld [vmem:[#allocation7 + $0x88] sm:$0xff]  ;;  %v4408_v36 = vld [vmem:[#allocation7 + $0x98] sm:$0xff]  ;;  %v6028_v38 = vand.u32 4294901760, %v4402_v33 }
  0x7c   : > { %6312 = vst [vmem:[#allocation15_spill] sm:$0xff] %v4373_v23  ;;  %3093 = vmatprep.subr.bf16.mxu0 %v4373_v23  ;;  %3477 = vmatprep.subr.bf16.mxu1 %v4373_v23  ;;  %v4416_v37 = vpack.c.bf16 %v6033_v29, %v6034_v28  ;;  %v6027_v39 = vand.u32 4294901760, %v4404_v34  ;;  %v4420_v40 = vld [vmem:[#allocation7 + $0x80] sm:$0xff]  ;;  %v4422_v41 = vld [vmem:[#allocation7 + $0x90] sm:$0xff]  ;;  %v6031_v43 = vand.u32 4294901760, %v4406_v35  ;;  %v6030_v44 = vand.u32 4294901760, %v4408_v36 }
  0x7d   : > { %6313 = vst [vmem:[#allocation16_spill] sm:$0xff] %v4388_v27  ;;  %6314 = vst [vmem:[#allocation17_spill] sm:$0xff] %v4398_v30  ;;  %v4430_v42 = vpack.c.bf16 %v6029_v32, %v6032_v31  ;;  %v4434_v45 = vld [vmem:[#allocation7 + $0xa8] sm:$0xff]  ;;  %v4436_v46 = vld [vmem:[#allocation7 + $0xb8] sm:$0xff]  ;;  %v6040_v48 = vand.u32 4294901760, %v4420_v40  ;;  %v6039_v49 = vand.u32 4294901760, %v4422_v41 }
  0x7e   : > { %6315 = vst [vmem:[#allocation18_spill] sm:$0xff] %v4416_v37  ;;  %v4438_v47 = vld [vmem:[#allocation7 + $0xa0] sm:$0xff]  ;;  %v4442_v50 = vld [vmem:[#allocation7 + $0xb0] sm:$0xff]  ;;  %v4444_v51 = vld [vmem:[#allocation7 + $0xc8] sm:$0xff]  ;;  %v4454_v53 = vpack.c.bf16 %v6027_v39, %v6028_v38  ;;  %v4468_v57 = vpack.c.bf16 %v6030_v44, %v6031_v43  ;;  %v6048_v58 = vand.u32 4294901760, %v4434_v45  ;;  %v6047_v59 = vand.u32 4294901760, %v4436_v46 }
  0x7f   : > { %3095 = vmatpush1.bf16.msra.mxu0 %v4388_v27  ;;  %3479 = vmatpush1.bf16.msra.mxu1 %v4388_v27  ;;  %6316 = vst [vmem:[#allocation19_spill] sm:$0xff] %v4430_v42  ;;  %v4446_v52 = vld [vmem:[#allocation7 + $0xd8] sm:$0xff]  ;;  %v4456_v54 = vld [vmem:[#allocation7 + $0xc0] sm:$0xff]  ;;  %v4458_v55 = vld [vmem:[#allocation7 + $0xd0] sm:$0xff]  ;;  %v6052_v63 = vand.u32 4294901760, %v4438_v47  ;;  %v6049_v39 = vand.u32 4294901760, %v4442_v50  ;;  %v4489_v43 = vpack.c.bf16 %v6039_v49, %v6040_v48 }
  0x80   : > { %3097 = vmatprep.subr.bf16.mxu0 %v4398_v30  ;;  %3481 = vmatprep.subr.bf16.mxu1 %v4398_v30  ;;  %6317 = vst [vmem:[#allocation20_spill] sm:$0xff] %v4454_v53  ;;  %v4460_v56 = vld [vmem:[#allocation7 + $0xe8] sm:$0xff]  ;;  %6319 = vst [vmem:[#allocation22_spill] sm:$0xff] %v4468_v57  ;;  %v4472_v60 = vld [vmem:[#allocation7 + $0xf8] sm:$0xff]  ;;  %v6051_v38 = vand.u32 4294901760, %v4444_v51  ;;  %v6050_v31 = vand.u32 4294901760, %v4446_v52  ;;  %v4506_v49 = vpack.c.bf16 %v6047_v59, %v6048_v58 }
  0x81   : > { %6318 = vst [vmem:[#allocation21_spill] sm:$0xff] %v4460_v56  ;;  %6320 = vst [vmem:[#allocation23_spill] sm:$0xff] %v4472_v60  ;;  %v4474_v61 = vld [vmem:[#allocation7 + $0xe0] sm:$0xff]  ;;  %v4476_v62 = vld [vmem:[#allocation7 + $0xf0] sm:$0xff]  ;;  %v6064_v29 = vand.u32 4294901760, %v4456_v54  ;;  %v6061_v28 = vand.u32 4294901760, %v4458_v55  ;;  %v4526_v59 = vpack.c.bf16 %v6049_v39, %v6052_v63 }
  0x82   : > { %6321 = vst [vmem:[#allocation24_spill] sm:$0xff] %v4474_v61  ;;  %6322 = vst [vmem:[#allocation25_spill] sm:$0xff] %v4476_v62  ;;  %v4481_v32 = vld [vmem:[#allocation7 + $0x108] sm:$0xff]  ;;  %v4483_v44 = vld [vmem:[#allocation7 + $0x118] sm:$0xff]  ;;  %v6063_v24 = vand.u32 4294901760, %v4460_v56  ;;  %v6062_v19 = vand.u32 4294901760, %v4472_v60  ;;  %v4532_v58 = vpack.c.bf16 %v6050_v31, %v6051_v38 }
  0x83   : > { %3099 = vmatpush1.bf16.msra.mxu0 %v4416_v37  ;;  %3483 = vmatpush1.bf16.msra.mxu1 %v4416_v37  ;;  %6323 = vst [vmem:[#allocation26_spill] sm:$0xff] %v4481_v32  ;;  %6324 = vst [vmem:[#allocation27_spill] sm:$0xff] %v4483_v44  ;;  %v4510_v10 = vld [vmem:[#allocation7 + $0x100] sm:$0xff]  ;;  %v4512_v9 = vld [vmem:[#allocation7 + $0x110] sm:$0xff]  ;;  %v4546_v39 = vpack.c.bf16 %v6061_v28, %v6064_v29  ;;  %v6340_v38 = vand.u32 4294901760, %v4474_v61  ;;  %v6341_v63 = vand.u32 4294901760, %v4476_v62 }
  0x84   : > { %3101 = vmatprep.subr.bf16.mxu0 %v4430_v42  ;;  %3485 = vmatprep.subr.bf16.mxu1 %v4430_v42  ;;  %6325 = vst [vmem:[#allocation28_spill] sm:$0xff] %v4489_v43  ;;  %6326 = vst [vmem:[#allocation29_spill] sm:$0xff] %v4506_v49  ;;  %v4514_v6 = vld [vmem:[#allocation7 + $0x128] sm:$0xff]  ;;  %v4516_v4 = vld [vmem:[#allocation7 + $0x138] sm:$0xff]  ;;  %v4552_v31 = vpack.c.bf16 %v6062_v19, %v6063_v24  ;;  %v6346_v19 = vand.u32 4294901760, %v4481_v32  ;;  %v6347_v24 = vand.u32 4294901760, %v4483_v44 }
  0x85   : > { %6327 = vst [vmem:[#allocation30_spill] sm:$0xff] %v4510_v10  ;;  %6328 = vst [vmem:[#allocation31_spill] sm:$0xff] %v4512_v9  ;;  %v4518_v3 = vld [vmem:[#allocation7 + $0x120] sm:$0xff]  ;;  %v4520_v16 = vld [vmem:[#allocation7 + $0x130] sm:$0xff]  ;;  %v6359_v22 = vand.u32 4294901760, %v4516_v4  ;;  %s2963_s27 = sshll.u32 %s238_s23, 4  ;;  %s5977_s27 = int_to_ptr.vmem [resolvable:$true] %s2963_s27 }
  0x86   : > { %6329 = vst [vmem:[#allocation32_spill] sm:$0xff] %v4514_v6  ;;  %6330 = vst [vmem:[#allocation33_spill] sm:$0xff] %v4516_v4  ;;  %v4534_v11 = vld [vmem:[#allocation7 + $0x148] sm:$0xff]  ;;  %v4536_v48 = vld [vmem:[#allocation7 + $0x158] sm:$0xff]  ;;  %v4573_v29 = vpack.c.bf16 %v6347_v24, %v6346_v19  ;;  %v6361_v32 = vand.u32 4294901760, %v4518_v3  ;;  %v6362_v62 = vand.u32 4294901760, %v4520_v16 }
  0x87   : > { %3103 = vmatpush1.bf16.msra.mxu0 %v4454_v53  ;;  %3487 = vmatpush1.bf16.msra.mxu1 %v4454_v53  ;;  %6331 = vst [vmem:[#allocation34_spill] sm:$0xff] %v4518_v3  ;;  %6332 = vst [vmem:[#allocation35_spill] sm:$0xff] %v4520_v16  ;;  %v4538_v17 = vld [vmem:[#allocation7 + $0x140] sm:$0xff]  ;;  %v4561_v53 = vld [vmem:[#allocation7 + $0x150] sm:$0xff]  ;;  %s4035_s22 = scalar_lea.vmem %s5977_s27, 32  ;;  %p6792_p13 = scmp.ne.s32.totalorder %s6304_s21, 0 }
  0x88   : > { %3105 = vmatprep.subr.bf16.mxu0 %v4468_v57  ;;  %3489 = vmatprep.subr.bf16.mxu1 %v4468_v57  ;;  %6333 = vst [vmem:[#allocation36_spill] sm:$0xff] %v4526_v59  ;;  %6334 = vst [vmem:[#allocation37_spill] sm:$0xff] %v4532_v58  ;;  %v4558_v57 = vpack.c.bf16 %v6341_v63, %v6340_v38  ;;  %v4563_v42 = vld [vmem:[#allocation7 + $0x168] sm:$0xff]  ;;  %v4565_v28 = vld [vmem:[#allocation7 + $0x178] sm:$0xff]  ;;  %v6356_v63 = vand.u32 4294901760, %v4512_v9  ;;  %v6367_v16 = vand.u32 4294901760, %v4538_v17  ;;  %p4036_p10 = scmp.ne.s32.totalorder %s5977_s27, %s4035_s22 }
  0x89   : > { %6335 = vst [vmem:[#allocation38_spill] sm:$0xff] %v4534_v11  ;;  %6336 = vst [vmem:[#allocation39_spill] sm:$0xff] %v4536_v48  ;;  %v4578_v37 = vld [vmem:[#allocation7 + $0x160] sm:$0xff]  ;;  %v4580_v30 = vld [vmem:[#allocation7 + $0x170] sm:$0xff]  ;;  %s4117_s16 = smov [#allocation8]  }
  0x8a   : > { %6337 = vst [vmem:[#allocation40_spill] sm:$0xff] %v4538_v17  ;;  %6338 = vst [vmem:[#allocation41_spill] sm:$0xff] %v4546_v39  ;;  %v240_v27 = vld [vmem:[%s4314_s7 + $0x8] sm:$0xff]  ;;  %v4618_v19 = vld [vmem:[#allocation7 + $0x180] sm:$0xff]  ;;  %p4037_p3 = pnand %p4036_p10, %p6792_p13  ;;  %s4039_s26 = sshll.u32 %s4117_s16, 4  ;;  %s4040_s26 = int_to_ptr.vmem [resolvable:$false] %s4039_s26 }
  0x8b   : > { %3107 = vmatpush1.bf16.msra.mxu0 %v4489_v43  ;;  %3491 = vmatpush1.bf16.msra.mxu1 %v4489_v43  ;;  %6339 = vst [vmem:[#allocation42_spill] sm:$0xff] %v4552_v31  ;;  %6342 = vst [vmem:[#allocation43_spill] sm:$0xff] %v4558_v57  ;;  %v4586_v15 = vand.u32 4294901760, %v240_v27  ;;  %v4592_v38 = vld [vmem:[#allocation7 + $0x188] sm:$0xff]  ;;  %v4594_v44 = vld [vmem:[#allocation7 + $0x198] sm:$0xff]  ;;  %v6355_v43 = vand.u32 4294901760, %v4510_v10  ;;  %p4042_p9 = scmp.lt.s32.totalorder %s5977_s27, %s4040_s26 }
  0x8c   : > { %6343 = vst [vmem:[#allocation44_spill] sm:$0xff] %v4561_v53  ;;  %6344 = vst [vmem:[#allocation45_spill] sm:$0xff] %v4563_v42  ;;  %3109 = vmatprep.subr.bf16.mxu0 %v4506_v49  ;;  %3493 = vmatprep.subr.bf16.mxu1 %v4506_v49  ;;  %v4645_v10 = vld [vmem:[#allocation7 + $0x1b8] sm:$0xff]  ;;  %v4704_v9 = vld [vmem:[#allocation7 + $0x1e8] sm:$0xff]  ;;  %p4038_p7 = pneg %p4037_p3  ;;  %s4041_s8 = scalar_lea.vmem %s4040_s26, 64 }
  0x8d   : > { %6345 = vst [vmem:[#allocation46_spill] sm:$0xff] %v4565_v28  ;;  %6348 = vst [vmem:[#allocation47_spill] sm:$0xff] %v4573_v29  ;;  %v4602_v24 = vsub.f32 %v240_v27, %v4586_v15  ;;  %v4610_v23 = vpack.c.bf16 %v6356_v63, %v6355_v43  ;;  %v4628_v63 = vld [vmem:[#allocation7 + $0x190] sm:$0xff]  ;;  %v6370_v43 = vand.u32 4294901760, %v4324_v0  ;;  %p4043_p2 = scmp.lt.s32.totalorder %s4041_s8, %s4035_s22 }
  0x8e   : > { %6349 = vst [vmem:[#allocation48_spill] sm:$0xff] %v4578_v37  ;;  %6350 = vst [vmem:[#allocation49_spill] sm:$0xff] %v4580_v30  ;;  %v6399_v56 = vand.u32 4294901760, %v4628_v63 }
  0x8f   : > { %6351 = vst [vmem:[#allocation50_spill] sm:$0xff] %v4586_v15  ;;  %6352 = vst [vmem:[#allocation51_spill] sm:$0xff] %v4592_v38  ;;  %3111 = vmatpush1.bf16.msra.mxu0 %v4526_v59  ;;  %3495 = vmatpush1.bf16.msra.mxu1 %v4526_v59  ;;  %v6358_v59 = vand.u32 4294901760, %v4514_v6  ;;  %v1592_v15 = vmul.f32 %v240_v27, %v240_v27  ;;  %v4630_v6 = vld [vmem:[#allocation7 + $0x1a8] sm:$0xff]  ;;  %v6365_v27 = vand.u32 4294901760, %v4536_v48  ;;  %v4671_v48 = vld [vmem:[#allocation7 + $0x1b0] sm:$0xff]  ;;  %p4044_p5 = por %p4043_p2, %p4042_p9 }
  0x90   : > { %6353 = vst [vmem:[#allocation52_spill] sm:$0xff] %v4594_v44  ;;  %6354 = vst [vmem:[#allocation53_spill] sm:$0xff] %v4602_v24  ;;  %3113 = vmatprep.subr.bf16.mxu0 %v4532_v58  ;;  %3497 = vmatprep.subr.bf16.mxu1 %v4532_v58  ;;  %v4624_v58 = vpack.c.bf16 %v6362_v62, %v6361_v32  ;;  %v6368_v32 = vand.u32 4294901760, %v4561_v53  ;;  %v4650_v3 = vsub.f32 %v4324_v0, %v6370_v43  ;;  %v4669_v43 = vld [vmem:[#allocation7 + $0x1a0] sm:$0xff] }
  0x91   : > { %6357 = vst [vmem:[#allocation54_spill] sm:$0xff] %v4610_v23  ;;  %v4616_v49 = vpack.c.bf16 %v6359_v22, %v6358_v59  ;;  %v6364_v59 = vand.u32 4294901760, %v4534_v11  ;;  %v4652_v22 = vand.u32 4294901760, %v1592_v15  ;;  %v6377_v53 = vand.u32 4294901760, %v4580_v30  ;;  %v4702_v11 = vld [vmem:[#allocation7 + $0x1d0] sm:$0xff]  ;;  %p4045_p1 = pnand %p4044_p5, %p4038_p7 }
  0x92   : > { %6363 = vst [vmem:[#allocation56_spill] sm:$0xff] %v4624_v58  ;;  %v4643_v62 = vpack.c.bf16 %v6368_v32, %v6367_v16  ;;  %6371 = vst [vmem:[#allocation59_spill] sm:$0xff] %v4650_v3  ;;  %v6376_v32 = vand.u32 4294901760, %v4578_v37  ;;  %v6382_v0 = vand.u32 4294901760, %v4326_v1 }
  0x93   : > { %6360 = vst [vmem:[#allocation55_spill] sm:$0xff] %v4616_v49  ;;  %v4637_v4 = vpack.c.bf16 %v6365_v27, %v6364_v59  ;;  %6372 = vst [vmem:[#allocation60_spill] sm:$0xff] %v4652_v22  ;;  %3115 = vmatpush1.bf16.msra.mxu0 %v4546_v39  ;;  %3499 = vmatpush1.bf16.msra.mxu1 %v4546_v39  ;;  %v6373_v59 = vand.u32 4294901760, %v4563_v42  ;;  %v6374_v27 = vand.u32 4294901760, %v4565_v28  ;;  %v4673_v39 = vld [vmem:[#allocation7 + $0x1c8] sm:$0xff]  ;;  %v6380_v42 = vand.u32 4294901760, %v4602_v24 }
  0x94   : > { %6369 = vst [vmem:[#allocation58_spill] sm:$0xff] %v4643_v62  ;;  %v4666_v17 = vpack.c.bf16 %v6377_v53, %v6376_v32  ;;  %6379 = vst [vmem:[#allocation63_spill] sm:$0xff] %v4673_v39  ;;  %3117 = vmatprep.subr.bf16.mxu0 %v4552_v31  ;;  %3501 = vmatprep.subr.bf16.mxu1 %v4552_v31  ;;  %v4684_v32 = vld [vmem:[#allocation7 + $0x1c0] sm:$0xff]  ;;  %v4689_v30 = vsub.f32 %v4326_v1, %v6382_v0  ;;  %v6386_v31 = vand.u32 4294901760, %v4594_v44 }
  0x95   : > { %6366 = vst [vmem:[#allocation57_spill] sm:$0xff] %v4637_v4  ;;  %v4660_v16 = vpack.c.bf16 %v6374_v27, %v6373_v59  ;;  %v438_v28 = vsub.f32 %v4602_v24, %v6380_v42  ;;  %v4682_v27 = vld [vmem:[#allocation7 + $0x1d8] sm:$0xff]  ;;  %v4692_v37 = vsub.f32 %v1592_v15, %v4652_v22  ;;  %v239_v42 = vld [vmem:[%s4314_s7] sm:$0xff]  ;;  %v6385_v24 = vand.u32 4294901760, %v4592_v38 }
  0x96   : > { %6378 = vst [vmem:[#allocation62_spill] sm:$0xff] %v4666_v17  ;;  %6381 = vst [vmem:[#allocation64_spill] sm:$0xff] %v4682_v27  ;;  %v4706_v60 = vand.u32 4294901760, %v239_v42  ;;  %v4709_v15 = vld [vmem:[#allocation7 + $0x1f8] sm:$0xff]  ;;  %v4711_v0 = vld [vmem:[#allocation7 + $0x1e0] sm:$0xff]  ;;  %v6392_v53 = vand.u32 4294901760, %v4328_v2 }
  0x97   : > { %6375 = vst [vmem:[#allocation61_spill] sm:$0xff] %v4660_v16  ;;  %6383 = vst [vmem:[#allocation65_spill] sm:$0xff] %v4689_v30  ;;  %v4699_v59 = vpack.c.bf16 %v6386_v31, %v6385_v24  ;;  %v439_v61 = vand.u32 4294901760, %v438_v28  ;;  %v4713_v38 = vld [vmem:[#allocation7 + $0x1f0] sm:$0xff]  ;;  %v6141_v24 = vand.u32 4294901760, %v4692_v37  ;;  %3119 = vmatpush1.bf16.msra.mxu0 %v4558_v57  ;;  %3503 = vmatpush1.bf16.msra.mxu1 %v4558_v57  ;;  %v6395_v31 = vand.u32 4294901760, %v4650_v3 }
  0x98   : > { %6384 = vst [vmem:[#allocation66_spill] sm:$0xff] %v4692_v37  ;;  %6388 = vst [vmem:[#allocation68_spill] sm:$0xff] %v4706_v60  ;;  %v4720_v44 = vsub.f32 %v4328_v2, %v6392_v53  ;;  %3121 = vmatprep.subr.bf16.mxu0 %v4573_v29  ;;  %3505 = vmatprep.subr.bf16.mxu1 %v4573_v29  ;;  %v4740_v57 = vsub.f32 %v239_v42, %v4706_v60 }
  0x99   : > { %6387 = vst [vmem:[#allocation67_spill] sm:$0xff] %v4699_v59  ;;  %6389 = vst [vmem:[#allocation69_spill] sm:$0xff] %v4709_v15  ;;  %v1724_v28 = vsub.f32 %v4692_v37, %v6141_v24  ;;  %440 = vmatprep.mubr.f32.mxu0 %v439_v61  ;;  %v4745_v2 = vsub.f32 %v4650_v3, %v6395_v31  ;;  %v6396_v24 = vand.u32 4294901760, %v4332_v5  ;;  %v6398_v61 = vand.u32 4294901760, %v4618_v19 }
  0x9a   : > { %6390 = vst [vmem:[#allocation70_spill] sm:$0xff] %v4711_v0  ;;  %6391 = vst [vmem:[#allocation71_spill] sm:$0xff] %v4713_v38  ;;  %v6401_v31 = vand.u32 4294901760, %v4630_v6  ;;  %v1591_v37 = vmul.f32 %v239_v42, %v239_v42 }
  0x9b   : > { %6393 = vst [vmem:[#allocation72_spill] sm:$0xff] %v4720_v44  ;;  %6394 = vst [vmem:[#allocation73_spill] sm:$0xff] %v4740_v57  ;;  %v1725_v53 = vand.u32 4294901760, %v1724_v28  ;;  %v4751_v1 = vsub.f32 %v4332_v5, %v6396_v24  ;;  %3123 = vmatpush1.bf16.msra.mxu0 %v4610_v23  ;;  %3507 = vmatpush1.bf16.msra.mxu1 %v4610_v23  ;;  %v4759_v22 = vpack.c.bf16 %v6399_v56, %v6398_v61 }
  0x9c   : > { %v6402_v28 = vand.u32 4294901760, %v4645_v10  ;;  %3125 = vmatprep.subr.bf16.mxu0 %v4616_v49  ;;  %3509 = vmatprep.subr.bf16.mxu1 %v4616_v49  ;;  %v6404_v5 = vand.u32 4294901760, %v4669_v43  ;;  %v6405_v24 = vand.u32 4294901760, %v4671_v48  ;;  %v6407_v56 = vand.u32 4294901760, %v4673_v39 }
  0x9d   : > { %6397 = vst [vmem:[#allocation74_spill] sm:$0xff] %v4751_v1  ;;  %6400 = vst [vmem:[#allocation75_spill] sm:$0xff] %v4759_v22  ;;  %v6408_v61 = vand.u32 4294901760, %v4682_v27  ;;  %v6412_v49 = vand.u32 4294901760, %v4702_v11  ;;  %1726 = vmatprep.mubr.f32.mxu1 %v1725_v53  ;;  %v4819_v53 = vand.u32 4294901760, %v1591_v37 }
  0x9e   : > { %v4765_v29 = vpack.c.bf16 %v6402_v28, %v6401_v31  ;;  %v4773_v23 = vpack.c.bf16 %v6405_v24, %v6404_v5  ;;  %v6410_v31 = vand.u32 4294901760, %v4689_v30  ;;  %v6411_v28 = vand.u32 4294901760, %v4684_v32 }
  0x9f   : > { %v4779_v60 = vpack.c.bf16 %v6408_v61, %v6407_v56  ;;  %v6414_v5 = vand.u32 4294901760, %v4704_v9  ;;  %v6415_v24 = vand.u32 4294901760, %v4709_v15  ;;  %v6417_v56 = vand.u32 4294901760, %v4711_v0  ;;  %3127 = vmatpush1.bf16.msra.mxu0 %v4624_v58  ;;  %3511 = vmatpush1.bf16.msra.mxu1 %v4624_v58  ;;  %6423 = vst [vmem:[#allocation83_spill] sm:$0xff] %v4819_v53 }
  0xa0   : > { %6403 = vst [vmem:[#allocation76_spill] sm:$0xff] %v4765_v29  ;;  %6406 = vst [vmem:[#allocation77_spill] sm:$0xff] %v4773_v23  ;;  %v4784_v42 = vsub.f32 %v4689_v30, %v6410_v31  ;;  %v4790_v3 = vpack.c.bf16 %v6412_v49, %v6411_v28  ;;  %v6418_v61 = vand.u32 4294901760, %v4713_v38  ;;  %v6420_v49 = vand.u32 4294901760, %v4720_v44  ;;  %3129 = vmatprep.subr.bf16.mxu0 %v4637_v4 }
  0xa1   : > { %6409 = vst [vmem:[#allocation78_spill] sm:$0xff] %v4779_v60  ;;  %v4796_v39 = vpack.c.bf16 %v6415_v24, %v6414_v5  ;;  %v6421_v5 = vand.u32 4294901760, %v4335_v7  ;;  %v6428_v15 = vand.u32 4294901760, %v4344_v13  ;;  %3513 = vmatprep.subr.bf16.mxu1 %v4637_v4  ;;  %v6430_v31 = vand.u32 4294901760, %v4346_v14 }
  0xa2   : > { %6413 = vst [vmem:[#allocation79_spill] sm:$0xff] %v4790_v3  ;;  %v4802_v27 = vpack.c.bf16 %v6418_v61, %v6417_v56  ;;  %v4809_v28 = vsub.f32 %v4720_v44, %v6420_v49  ;;  %v6424_v56 = vand.u32 4294901760, %v4337_v8  ;;  %v6426_v49 = vand.u32 4294901760, %v4342_v12 }
  0xa3   : > { %6416 = vst [vmem:[#allocation80_spill] sm:$0xff] %v4796_v39  ;;  %v4815_v24 = vsub.f32 %v4335_v7, %v6421_v5  ;;  %v4834_v7 = vsub.f32 %v4344_v13, %v6428_v15  ;;  %v6435_v15 = vand.u32 4294901760, %v4361_v21  ;;  %v6436_v5 = vand.u32 4294901760, %v4376_v25  ;;  %3131 = vmatpush1.bf16.msra.mxu0 %v4643_v62  ;;  %3515 = vmatpush1.bf16.msra.mxu1 %v4643_v62 }
  0xa4   : > { %6419 = vst [vmem:[#allocation81_spill] sm:$0xff] %v4802_v27  ;;  %v4824_v61 = vsub.f32 %v4337_v8, %v6424_v56  ;;  %v4829_v30 = vsub.f32 %v4342_v12, %v6426_v49  ;;  %v4842_v8 = vsub.f32 %v4346_v14, %v6430_v31  ;;  %v6432_v56 = vand.u32 4294901760, %v4356_v18  ;;  %3133 = vmatprep.subr.bf16.mxu0 %v4660_v16 }
  0xa5   : > { %6422 = vst [vmem:[#allocation82_spill] sm:$0xff] %v4815_v24  ;;  %6429 = vst [vmem:[#allocation86_spill] sm:$0xff] %v4834_v7  ;;  %v6434_v49 = vand.u32 4294901760, %v4359_v20  ;;  %v4857_v4 = vsub.f32 %v4361_v21, %v6435_v15  ;;  %v4862_v14 = vsub.f32 %v4376_v25, %v6436_v5  ;;  %v6437_v31 = vand.u32 4294901760, %v4378_v26  ;;  %3517 = vmatprep.subr.bf16.mxu1 %v4660_v16 }
  0xa6   : > { %6425 = vst [vmem:[#allocation84_spill] sm:$0xff] %v4824_v61  ;;  %6427 = vst [vmem:[#allocation85_spill] sm:$0xff] %v4829_v30  ;;  %v4847_v12 = vsub.f32 %v4356_v18, %v6432_v56  ;;  %v6438_v56 = vand.u32 4294901760, %v4402_v33  ;;  %v6441_v15 = vand.u32 4294901760, %v4751_v1  ;;  %v6445_v58 = vand.u32 4294901760, %v4815_v24 }
  0xa7   : > { %6431 = vst [vmem:[#allocation87_spill] sm:$0xff] %v4842_v8  ;;  %v4852_v13 = vsub.f32 %v4359_v20, %v6434_v49  ;;  %v4867_v18 = vsub.f32 %v4378_v26, %v6437_v31  ;;  %v6440_v49 = vand.u32 4294901760, %v4740_v57  ;;  %v6442_v26 = vand.u32 4294901760, %v4404_v34  ;;  %3135 = vmatpush1.bf16.msra.mxu0 %v4666_v17  ;;  %3519 = vmatpush1.bf16.msra.mxu1 %v4666_v17 }
  0xa8   : > { %6433 = vst [vmem:[#allocation88_spill] sm:$0xff] %v4847_v12  ;;  %v4872_v20 = vsub.f32 %v4402_v33, %v6438_v56  ;;  %v4882_v25 = vsub.f32 %v4751_v1, %v6441_v15  ;;  %v4893_v33 = vsub.f32 %v1591_v37, %v4819_v53  ;;  %v479_v16 = vsub.f32 %v4815_v24, %v6445_v58 }
  0xa9   : > { %v4877_v21 = vsub.f32 %v4740_v57, %v6440_v49  ;;  %v4888_v31 = vsub.f32 %v4404_v34, %v6442_v26  ;;  %v462_v34 = vand.u32 4294901760, %v4809_v28  ;;  %v6446_v26 = vand.u32 4294901760, %v4406_v35  ;;  %3137 = vmatprep.subr.bf16.mxu0 %v4699_v59  ;;  %3521 = vmatprep.subr.bf16.mxu1 %v4699_v59 }
  0xaa   : > { %6439 = vst [vmem:[#allocation89_spill] sm:$0xff] %v4872_v20  ;;  %6444 = vst [vmem:[#allocation91_spill] sm:$0xff] %v4893_v33  ;;  %v6447_v62 = vand.u32 4294901760, %v4408_v36  ;;  %v6448_v58 = vand.u32 4294901760, %v4824_v61  ;;  %v6449_v49 = vand.u32 4294901760, %v4829_v30  ;;  %v6455_v59 = vand.u32 4294901760, %v4862_v14 }
  0xab   : > { %6443 = vst [vmem:[#allocation90_spill] sm:$0xff] %v4888_v31  ;;  %v4915_v5 = vsub.f32 %v4406_v35, %v6446_v26  ;;  %v6450_v26 = vand.u32 4294901760, %v4834_v7  ;;  %3139 = vmatpush1.bf16.msra.mxu0 %v4759_v22  ;;  %3523 = vmatpush1.bf16.msra.mxu1 %v4759_v22  ;;  %v480_v24 = vand.u32 4294901760, %v479_v16 }
  0xac   : > { %v4920_v37 = vsub.f32 %v4408_v36, %v6447_v62  ;;  %v491_v28 = vsub.f32 %v4824_v61, %v6448_v58  ;;  %v485_v35 = vsub.f32 %v4829_v30, %v6449_v49  ;;  %v474_v36 = vand.u32 4294901760, %v4882_v25  ;;  %3141 = vmatprep.subr.bf16.mxu0 %v4765_v29  ;;  %3525 = vmatprep.subr.bf16.mxu1 %v4765_v29 }
  0xad   : > { %v497_v56 = vsub.f32 %v4834_v7, %v6450_v26  ;;  %v6451_v62 = vand.u32 4294901760, %v4842_v8  ;;  %v6452_v58 = vand.u32 4294901760, %v4847_v12  ;;  %v6453_v49 = vand.u32 4294901760, %v4852_v13 }
  0xae   : > { %v6454_v26 = vand.u32 4294901760, %v4857_v4  ;;  %v527_v25 = vsub.f32 %v4862_v14, %v6455_v59  ;;  %v6456_v30 = vand.u32 4294901760, %v4867_v18  ;;  %v6459_v61 = vand.u32 4294901760, %v4420_v40 }
  0xaf   : > { %v503_v15 = vsub.f32 %v4842_v8, %v6451_v62  ;;  %v515_v17 = vsub.f32 %v4847_v12, %v6452_v58  ;;  %v509_v57 = vsub.f32 %v4852_v13, %v6453_v49  ;;  %v6457_v8 = vand.u32 4294901760, %v4872_v20  ;;  %3143 = vmatpush1.bf16.msra.mxu0 %v4773_v23  ;;  %3527 = vmatpush1.bf16.msra.mxu1 %v4773_v23 }
  0xb0   : > { %v521_v7 = vsub.f32 %v4857_v4, %v6454_v26  ;;  %v539_v62 = vsub.f32 %v4867_v18, %v6456_v30  ;;  %v6458_v12 = vand.u32 4294901760, %v4888_v31  ;;  %v4966_v59 = vsub.f32 %v4420_v40, %v6459_v61  ;;  %3145 = vmatprep.subr.bf16.mxu0 %v4779_v60  ;;  %3529 = vmatprep.subr.bf16.mxu1 %v4779_v60 }
  0xb1   : > { %v533_v58 = vsub.f32 %v4872_v20, %v6457_v8  ;;  %v6461_v30 = vand.u32 4294901760, %v4893_v33  ;;  %v486_v1 = vand.u32 4294901760, %v485_v35  ;;  %v498_v26 = vand.u32 4294901760, %v497_v56 }
  0xb2   : > { %v545_v49 = vsub.f32 %v4888_v31, %v6458_v12  ;;  %6460 = vst [vmem:[#allocation92_spill] sm:$0xff] %v4966_v59  ;;  %v492_v12 = vand.u32 4294901760, %v491_v28  ;;  %v504_v53 = vand.u32 4294901760, %v503_v15  ;;  %v516_v40 = vand.u32 4294901760, %v515_v17 }
  0xb3   : > { %v4973_v8 = vsub.f32 %v4893_v33, %v6461_v30  ;;  %v510_v61 = vand.u32 4294901760, %v509_v57  ;;  %v522_v44 = vand.u32 4294901760, %v521_v7  ;;  %v528_v38 = vand.u32 4294901760, %v527_v25  ;;  %3147 = vmatpush1.bf16.msra.mxu0 %v4790_v3  ;;  %3531 = vmatpush1.bf16.msra.mxu1 %v4790_v3  ;;  %v6510_v3 = vld [vmem:[#allocation30_spill] sm:$0xff] }
  0xb4   : > { %v540_v0 = vand.u32 4294901760, %v539_v62  ;;  %v534_v22 = vand.u32 4294901760, %v533_v58  ;;  %v546_v31 = vand.u32 4294901760, %v545_v49  ;;  %v6462_v20 = vand.u32 4294901760, %v4915_v5  ;;  %3149 = vmatprep.subr.bf16.mxu0 %v4796_v39  ;;  %3533 = vmatprep.subr.bf16.mxu1 %v4796_v39 }
  0xb5   : > { %v6463_v16 = vand.u32 4294901760, %v4920_v37  ;;  %v6204_v35 = vand.u32 4294901760, %v4966_v59  ;;  %v6464_v17 = vand.u32 4294901760, %v4745_v2  ;;  %v6465_v57 = vand.u32 4294901760, %v4784_v42 }
  0xb6   : > { %v551_v30 = vsub.f32 %v4915_v5, %v6462_v20  ;;  %v445_v56 = vand.u32 4294901760, %v4877_v21  ;;  %v3154_v15 = vpack.c.bf16 %v474_v36, %v462_v34  ;;  %v6466_v20 = vand.u32 4294901760, %v4422_v41 }
  0xb7   : > { %v563_v28 = vsub.f32 %v4920_v37, %v6463_v16  ;;  %v3152_v7 = vpack.c.bf16 %v6465_v57, %v6464_v17  ;;  %v1731_v62 = vand.u32 4294901760, %v4973_v8  ;;  %v3156_v58 = vpack.c.bf16 %v492_v12, %v480_v24  ;;  %3151 = vmatpush1.bf16.msra.mxu0 %v4802_v27  ;;  %3535 = vmatpush1.bf16.msra.mxu1 %v4802_v27 }
  0xb8   : > { %v4994_v25 = vsub.f32 %v4422_v41, %v6466_v20  ;;  %v4999_v49 = vpack.c.bf16 %v498_v26, %v486_v1  ;;  %v6468_v2 = vand.u32 4294901760, %v4434_v45  ;;  %v5006_v21 = vpack.c.bf16 %v516_v40, %v504_v53  ;;  %v6487_v20 = vld [vmem:[#allocation23_spill] sm:$0xff] }
  0xb9   : > { %v5008_v34 = vpack.c.bf16 %v522_v44, %v510_v61  ;;  %v5010_v41 = vpack.c.bf16 %v540_v0, %v528_v38  ;;  %v6470_v36 = vand.u32 4294901760, %v4436_v46  ;;  %v5017_v8 = vpack.c.bf16 %v546_v31, %v534_v22  ;;  %3153 = vmatprep.subr.bf16.mxu0 %v3152_v7  ;;  %3537 = vmatprep.subr.bf16.mxu1 %v3152_v7 }
  0xba   : > { %6467 = vst [vmem:[#allocation93_spill] sm:$0xff] %v4994_v25  ;;  %v5004_v42 = vsub.f32 %v4434_v45, %v6468_v2  ;;  %v552_v1 = vand.u32 4294901760, %v551_v30  ;;  %v564_v24 = vand.u32 4294901760, %v563_v28  ;;  %v5022_v45 = vsub.f32 %v4966_v59, %v6204_v35  ;;  %v6484_v28 = vld [vmem:[#allocation21_spill] sm:$0xff]  ;;  %446 = vmatmul.mubr.f32.vlgmr.msra.gmra.mrb[0].mxu0 %v445_v56  ;;  %1732 = vmatmul.mubr.f32.vlgmr.msra.gmra.mrb[0].mxu1 %v1731_v62  ;;  %v6505_v35 = vld [vmem:[#allocation50_spill] sm:$0xff] }
  0xbb   : > { %v5015_v16 = vsub.f32 %v4436_v46, %v6470_v36  ;;  %v6202_v44 = vand.u32 4294901760, %v4994_v25  ;;  %v6472_v38 = vand.u32 4294901760, %v4438_v47  ;;  %v6474_v22 = vand.u32 4294901760, %v4442_v50  ;;  %v6490_v36 = vld [vmem:[#allocation24_spill] sm:$0xff]  ;;  %3155 = vmatpush1.bf16.msra.mxu0 %v3154_v15  ;;  %3539 = vmatpush1.bf16.msra.mxu1 %v3154_v15 }
  0xbc   : > { %6469 = vst [vmem:[#allocation94_spill] sm:$0xff] %v5004_v42  ;;  %v6476_v53 = vand.u32 4294901760, %v4444_v51  ;;  %v6203_v26 = vand.u32 4294901760, %v5004_v42  ;;  %v6478_v12 = vand.u32 4294901760, %v4446_v52  ;;  %v6480_v40 = vand.u32 4294901760, %v4456_v54  ;;  %3157 = vmatprep.subr.bf16.mxu0 %v3156_v58  ;;  %3541 = vmatprep.subr.bf16.mxu1 %v3156_v58 }
  0xbd   : > { %6471 = vst [vmem:[#allocation95_spill] sm:$0xff] %v5015_v16  ;;  %v5030_v46 = vsub.f32 %v4438_v47, %v6472_v38  ;;  %v5035_v0 = vsub.f32 %v4442_v50, %v6474_v22  ;;  %v6482_v61 = vand.u32 4294901760, %v4458_v55  ;;  %v6205_v30 = vand.u32 4294901760, %v5015_v16  ;;  %837 = vmatprep.mubr.f32.mxu0 %v6505_v35 }
  0xbe   : > { %v5040_v31 = vsub.f32 %v4444_v51, %v6476_v53  ;;  %v5048_v47 = vsub.f32 %v4446_v52, %v6478_v12  ;;  %v5053_v50 = vsub.f32 %v4456_v54, %v6480_v40  ;;  %v6485_v17 = vand.u32 4294901760, %v6484_v28  ;;  %v6496_v40 = vld [vmem:[#allocation26_spill] sm:$0xff] }
  0xbf   : > { %6473 = vst [vmem:[#allocation96_spill] sm:$0xff] %v5030_v46  ;;  %6475 = vst [vmem:[#allocation97_spill] sm:$0xff] %v5035_v0  ;;  %v5058_v51 = vsub.f32 %v4458_v55, %v6482_v61  ;;  %v6488_v52 = vand.u32 4294901760, %v6487_v20  ;;  %v6491_v54 = vand.u32 4294901760, %v6490_v36  ;;  %v5076_v22 = vpack.c.bf16 %v564_v24, %v552_v1  ;;  %v6493_v55 = vld [vmem:[#allocation25_spill] sm:$0xff]  ;;  %3159 = vmatpush1.bf16.msra.mxu0 %v4999_v49 }
  0xc0   : > { %6477 = vst [vmem:[#allocation98_spill] sm:$0xff] %v5040_v31  ;;  %6479 = vst [vmem:[#allocation99_spill] sm:$0xff] %v5048_v47  ;;  %v5064_v57 = vsub.f32 %v6484_v28, %v6485_v17  ;;  %v6494_v53 = vand.u32 4294901760, %v6493_v55  ;;  %v6497_v61 = vand.u32 4294901760, %v6496_v40  ;;  %v6499_v17 = vld [vmem:[#allocation27_spill] sm:$0xff]  ;;  %v5098_v1 = vsub.f32 %v4994_v25, %v6202_v44  ;;  %3543 = vmatpush1.bf16.msra.mxu1 %v4999_v49  ;;  %v6519_v49 = vld [vmem:[#allocation33_spill] sm:$0xff] }
  0xc1   : > { %6481 = vst [vmem:[#allocation100_spill] sm:$0xff] %v5053_v50  ;;  %6483 = vst [vmem:[#allocation101_spill] sm:$0xff] %v5058_v51  ;;  %v5069_v2 = vsub.f32 %v6487_v20, %v6488_v52  ;;  %v5074_v38 = vsub.f32 %v6490_v36, %v6491_v54  ;;  %v6500_v20 = vand.u32 4294901760, %v6499_v17  ;;  %v6206_v24 = vand.u32 4294901760, %v5030_v46  ;;  %3161 = vmatprep.subr.bf16.mxu0 %v5006_v21 }
  0xc2   : > { %6486 = vst [vmem:[#allocation21_spill] sm:$0xff] %v5064_v57  ;;  %v5081_v12 = vsub.f32 %v6493_v55, %v6494_v53  ;;  %v5086_v28 = vsub.f32 %v6496_v40, %v6497_v61  ;;  %v6207_v36 = vand.u32 4294901760, %v5035_v0  ;;  %v6208_v54 = vand.u32 4294901760, %v5040_v31  ;;  %3545 = vmatprep.subr.bf16.mxu1 %v5006_v21 }
  0xc3   : > { %6489 = vst [vmem:[#allocation23_spill] sm:$0xff] %v5069_v2  ;;  %6492 = vst [vmem:[#allocation24_spill] sm:$0xff] %v5074_v38  ;;  %v5091_v52 = vsub.f32 %v6499_v17, %v6500_v20  ;;  %v5106_v55 = vsub.f32 %v5004_v42, %v6203_v26  ;;  %v6209_v53 = vand.u32 4294901760, %v5048_v47  ;;  %v587_v17 = vsub.f32 %v5015_v16, %v6205_v30 }
  0xc4   : > { %6495 = vst [vmem:[#allocation25_spill] sm:$0xff] %v5081_v12  ;;  %6498 = vst [vmem:[#allocation26_spill] sm:$0xff] %v5086_v28  ;;  %v6212_v20 = vand.u32 4294901760, %v5064_v57  ;;  %v6219_v7 = vand.u32 4294901760, %v5074_v38  ;;  %v558_v26 = vand.u32 4294901760, %v5022_v45  ;;  %v570_v30 = vand.u32 4294901760, %v5098_v1  ;;  %3163 = vmatpush1.bf16.msra.mxu0 %v5008_v34  ;;  %3547 = vmatpush1.bf16.msra.mxu1 %v5008_v34 }
  0xc5   : > { %6501 = vst [vmem:[#allocation27_spill] sm:$0xff] %v5091_v52  ;;  %v581_v44 = vsub.f32 %v5030_v46, %v6206_v24  ;;  %v593_v56 = vsub.f32 %v5035_v0, %v6207_v36  ;;  %v599_v62 = vsub.f32 %v5040_v31, %v6208_v54  ;;  %v576_v45 = vand.u32 4294901760, %v5106_v55  ;;  %3165 = vmatprep.subr.bf16.mxu0 %v5010_v41 }
  0xc6   : > { %v611_v15 = vsub.f32 %v5048_v47, %v6209_v53  ;;  %v6502_v1 = vand.u32 4294901760, %v5053_v50  ;;  %v6503_v61 = vand.u32 4294901760, %v5058_v51  ;;  %v588_v40 = vand.u32 4294901760, %v587_v17  ;;  %3549 = vmatprep.subr.bf16.mxu1 %v5010_v41 }
  0xc7   : > { %v623_v54 = vsub.f32 %v5064_v57, %v6212_v20  ;;  %v6504_v58 = vand.u32 4294901760, %v5069_v2  ;;  %v629_v53 = vsub.f32 %v5074_v38, %v6219_v7  ;;  %v6507_v27 = vand.u32 4294901760, %v5081_v12 }
  0xc8   : > { %v605_v24 = vsub.f32 %v5053_v50, %v6502_v1  ;;  %v617_v36 = vsub.f32 %v5058_v51, %v6503_v61  ;;  %v6506_v1 = vld [vmem:[#allocation60_spill] sm:$0xff]  ;;  %v6508_v17 = vand.u32 4294901760, %v5086_v28  ;;  %v6509_v39 = vand.u32 4294901760, %v5091_v52  ;;  %3167 = vmatpush1.bf16.msra.mxu0 %v5017_v8  ;;  %3551 = vmatpush1.bf16.msra.mxu1 %v5017_v8 }
  0xc9   : > { %v635_v55 = vsub.f32 %v5069_v2, %v6504_v58  ;;  %2123 = vmatprep.mubr.f32.mxu1 %v6506_v1  ;;  %v641_v61 = vsub.f32 %v5081_v12, %v6507_v27  ;;  %v6511_v60 = vand.u32 4294901760, %v6510_v3  ;;  %v582_v1 = vand.u32 4294901760, %v581_v44  ;;  %v6513_v27 = vld [vmem:[#allocation31_spill] sm:$0xff]  ;;  %3169 = vmatprep.subr.bf16.mxu0 %v5076_v22 }
  0xca   : > { %v647_v20 = vsub.f32 %v5086_v28, %v6508_v17  ;;  %v659_v58 = vsub.f32 %v5091_v52, %v6509_v39  ;;  %v594_v35 = vand.u32 4294901760, %v593_v56  ;;  %v6514_v23 = vand.u32 4294901760, %v6513_v27  ;;  %v6516_v17 = vld [vmem:[#allocation32_spill] sm:$0xff]  ;;  %3553 = vmatprep.subr.bf16.mxu1 %v5076_v22 }
  0xcb   : > { %v5164_v7 = vsub.f32 %v6510_v3, %v6511_v60  ;;  %v6517_v33 = vand.u32 4294901760, %v6516_v17  ;;  %v600_v3 = vand.u32 4294901760, %v599_v62  ;;  %v612_v60 = vand.u32 4294901760, %v611_v15  ;;  %v6522_v15 = vld [vmem:[#allocation34_spill] sm:$0xff] }
  0xcc   : > { %v5171_v29 = vsub.f32 %v6513_v27, %v6514_v23  ;;  %v606_v52 = vand.u32 4294901760, %v605_v24  ;;  %v6520_v44 = vand.u32 4294901760, %v6519_v49  ;;  %v618_v28 = vand.u32 4294901760, %v617_v36 }
  0xcd   : > { %6512 = vst [vmem:[#allocation30_spill] sm:$0xff] %v5164_v7  ;;  %v5176_v39 = vsub.f32 %v6516_v17, %v6517_v33  ;;  %v624_v23 = vand.u32 4294901760, %v623_v54  ;;  %v636_v27 = vand.u32 4294901760, %v635_v55  ;;  %v630_v12 = vand.u32 4294901760, %v629_v53 }
  0xce   : > { %6515 = vst [vmem:[#allocation31_spill] sm:$0xff] %v5171_v29  ;;  %v5183_v56 = vsub.f32 %v6519_v49, %v6520_v44  ;;  %v642_v38 = vand.u32 4294901760, %v641_v61  ;;  %v648_v2 = vand.u32 4294901760, %v647_v20  ;;  %v660_v33 = vand.u32 4294901760, %v659_v58  ;;  %v6525_v20 = vld [vmem:[#allocation35_spill] sm:$0xff] }
  0xcf   : > { %6518 = vst [vmem:[#allocation32_spill] sm:$0xff] %v5176_v39  ;;  %v6238_v17 = vand.u32 4294901760, %v5164_v7  ;;  %v3170_v21 = vpack.c.bf16 %v570_v30, %v558_v26  ;;  %v6237_v24 = vand.u32 4294901760, %v5171_v29  ;;  %v6523_v49 = vand.u32 4294901760, %v6522_v15  ;;  %v6528_v26 = vld [vmem:[#allocation38_spill] sm:$0xff] }
  0xd0   : > { %6521 = vst [vmem:[#allocation33_spill] sm:$0xff] %v5183_v56  ;;  %v3172_v54 = vpack.c.bf16 %v588_v40, %v576_v45  ;;  %v6236_v53 = vand.u32 4294901760, %v5183_v56  ;;  %v6526_v55 = vand.u32 4294901760, %v6525_v20  ;;  %v6529_v30 = vand.u32 4294901760, %v6528_v26 }
  0xd1   : > { %v5193_v36 = vsub.f32 %v6522_v15, %v6523_v49  ;;  %v3174_v58 = vpack.c.bf16 %v594_v35, %v582_v1  ;;  %v3176_v44 = vpack.c.bf16 %v612_v60, %v600_v3  ;;  %v5208_v15 = vpack.c.bf16 %v618_v28, %v606_v52  ;;  %v6531_v49 = vld [vmem:[#allocation39_spill] sm:$0xff]  ;;  %v6556_v3 = vld [vmem:[#allocation52_spill] sm:$0xff]  ;;  %3171 = vmatpush1.bf16.msra.mxu0 %v3170_v21 }
  0xd2   : > { %v5201_v34 = vsub.f32 %v6525_v20, %v6526_v55  ;;  %v5206_v61 = vsub.f32 %v6528_v26, %v6529_v30  ;;  %v6532_v62 = vand.u32 4294901760, %v6531_v49  ;;  %v5215_v40 = vpack.c.bf16 %v636_v27, %v624_v23  ;;  %v6538_v23 = vld [vmem:[#allocation44_spill] sm:$0xff]  ;;  %v6541_v26 = vld [vmem:[#allocation45_spill] sm:$0xff]  ;;  %v6553_v60 = vld [vmem:[#allocation51_spill] sm:$0xff]  ;;  %3555 = vmatpush1.bf16.msra.mxu1 %v3170_v21  ;;  %3173 = vmatprep.subr.bf16.mxu0 %v3172_v54 }
  0xd3   : > { %6524 = vst [vmem:[#allocation34_spill] sm:$0xff] %v5193_v36  ;;  %v5217_v45 = vpack.c.bf16 %v642_v38, %v630_v12  ;;  %v5219_v20 = vpack.c.bf16 %v660_v33, %v648_v2  ;;  %v5224_v55 = vsub.f32 %v5164_v7, %v6238_v17  ;;  %v5231_v35 = vsub.f32 %v5171_v29, %v6237_v24  ;;  %v6535_v12 = vld [vmem:[#allocation40_spill] sm:$0xff] }
  0xd4   : > { %6527 = vst [vmem:[#allocation35_spill] sm:$0xff] %v5201_v34  ;;  %6530 = vst [vmem:[#allocation38_spill] sm:$0xff] %v5206_v61  ;;  %v5213_v41 = vsub.f32 %v6531_v49, %v6532_v62  ;;  %v6534_v28 = vand.u32 4294901760, %v5176_v39  ;;  %v6239_v2 = vand.u32 4294901760, %v5193_v36  ;;  %v6536_v52 = vand.u32 4294901760, %v6535_v12  ;;  %v6544_v49 = vld [vmem:[#allocation46_spill] sm:$0xff]  ;;  %3557 = vmatprep.subr.bf16.mxu1 %v3172_v54 }
  0xd5   : > { %v5249_v8 = vsub.f32 %v5183_v56, %v6236_v53  ;;  %v6539_v27 = vand.u32 4294901760, %v6538_v23  ;;  %v6542_v30 = vand.u32 4294901760, %v6541_v26  ;;  %v6560_v21 = vand.u32 4294901760, %v5206_v61  ;;  %3175 = vmatpush1.bf16.msra.mxu0 %v3174_v58 }
  0xd6   : > { %6533 = vst [vmem:[#allocation39_spill] sm:$0xff] %v5213_v41  ;;  %v5236_v38 = vsub.f32 %v5176_v39, %v6534_v28  ;;  %v5242_v1 = vsub.f32 %v6535_v12, %v6536_v52  ;;  %v6545_v28 = vand.u32 4294901760, %v6544_v49  ;;  %v6547_v52 = vld [vmem:[#allocation48_spill] sm:$0xff]  ;;  %3559 = vmatpush1.bf16.msra.mxu1 %v3174_v58  ;;  %3177 = vmatprep.subr.bf16.mxu0 %v3176_v44 }
  0xd7   : > { %v5256_v33 = vsub.f32 %v6538_v23, %v6539_v27  ;;  %v5262_v22 = vsub.f32 %v6541_v26, %v6542_v30  ;;  %v6548_v53 = vand.u32 4294901760, %v6547_v52  ;;  %v6550_v27 = vld [vmem:[#allocation49_spill] sm:$0xff]  ;;  %v6554_v26 = vand.u32 4294901760, %v6553_v60  ;;  %3561 = vmatprep.subr.bf16.mxu1 %v3176_v44 }
  0xd8   : > { %6537 = vst [vmem:[#allocation40_spill] sm:$0xff] %v5242_v1  ;;  %v5267_v12 = vsub.f32 %v6544_v49, %v6545_v28  ;;  %v6551_v17 = vand.u32 4294901760, %v6550_v27  ;;  %v6557_v49 = vand.u32 4294901760, %v6556_v3  ;;  %v6564_v54 = vand.u32 4294901760, %v5242_v1 }
  0xd9   : > { %6540 = vst [vmem:[#allocation44_spill] sm:$0xff] %v5256_v33  ;;  %6543 = vst [vmem:[#allocation45_spill] sm:$0xff] %v5262_v22  ;;  %v5272_v24 = vsub.f32 %v6547_v52, %v6548_v53  ;;  %v5283_v30 = vsub.f32 %v6553_v60, %v6554_v26  ;;  %v666_v53 = vand.u32 4294901760, %v5231_v35  ;;  %v684_v60 = vand.u32 4294901760, %v5249_v8  ;;  %3179 = vmatpush1.bf16.msra.mxu0 %v5208_v15 }
  0xda   : > { %6546 = vst [vmem:[#allocation46_spill] sm:$0xff] %v5267_v12  ;;  %v5278_v62 = vsub.f32 %v6550_v27, %v6551_v17  ;;  %v5288_v28 = vsub.f32 %v6556_v3, %v6557_v49  ;;  %v5295_v17 = vsub.f32 %v5193_v36, %v6239_v2  ;;  %v6559_v3 = vand.u32 4294901760, %v5201_v34  ;;  %3563 = vmatpush1.bf16.msra.mxu1 %v5208_v15 }
  0xdb   : > { %6549 = vst [vmem:[#allocation48_spill] sm:$0xff] %v5272_v24  ;;  %6555 = vst [vmem:[#allocation51_spill] sm:$0xff] %v5283_v30  ;;  %v5307_v35 = vsub.f32 %v5206_v61, %v6560_v21  ;;  %v6561_v2 = vand.u32 4294901760, %v5213_v41  ;;  %v6562_v21 = vand.u32 4294901760, %v4618_v19  ;;  %v701_v8 = vsub.f32 %v5242_v1, %v6564_v54  ;;  %3181 = vmatprep.subr.bf16.mxu0 %v5215_v40 }
  0xdc   : > { %6552 = vst [vmem:[#allocation49_spill] sm:$0xff] %v5278_v62  ;;  %6558 = vst [vmem:[#allocation52_spill] sm:$0xff] %v5288_v28  ;;  %v5302_v26 = vsub.f32 %v5201_v34, %v6559_v3  ;;  %v6565_v23 = vand.u32 4294901760, %v4628_v63  ;;  %v6567_v34 = vand.u32 4294901760, %v4630_v6  ;;  %v6572_v1 = vand.u32 4294901760, %v5262_v22  ;;  %3565 = vmatprep.subr.bf16.mxu1 %v5215_v40 }
  0xdd   : > { %v707_v52 = vsub.f32 %v5213_v41, %v6561_v2  ;;  %v5322_v49 = vsub.f32 %v4618_v19, %v6562_v21  ;;  %v678_v2 = vand.u32 4294901760, %v5295_v17  ;;  %v696_v58 = vand.u32 4294901760, %v5307_v35  ;;  %3183 = vmatpush1.bf16.msra.mxu0 %v5217_v45 }
  0xde   : > { %v5331_v3 = vsub.f32 %v4628_v63, %v6565_v23  ;;  %v5336_v27 = vsub.f32 %v4630_v6, %v6567_v34  ;;  %v690_v19 = vand.u32 4294901760, %v5302_v26  ;;  %v6569_v17 = vand.u32 4294901760, %v5256_v33  ;;  %3567 = vmatpush1.bf16.msra.mxu1 %v5217_v45  ;;  %3185 = vmatprep.subr.bf16.mxu0 %v5219_v20 }
  0xdf   : > { %6563 = vst [vmem:[#allocation102_spill] sm:$0xff] %v5322_v49  ;;  %v6570_v21 = vand.u32 4294901760, %v4645_v10  ;;  %v708_v23 = vand.u32 4294901760, %v707_v52  ;;  %v719_v6 = vsub.f32 %v5262_v22, %v6572_v1  ;;  %v6573_v34 = vand.u32 4294901760, %v5267_v12  ;;  %3569 = vmatprep.subr.bf16.mxu1 %v5219_v20 }
  0xe0   : > { %6566 = vst [vmem:[#allocation103_spill] sm:$0xff] %v5331_v3  ;;  %6568 = vst [vmem:[#allocation104_spill] sm:$0xff] %v5336_v27  ;;  %v713_v54 = vsub.f32 %v5256_v33, %v6569_v17  ;;  %v6574_v26 = vand.u32 4294901760, %v5272_v24  ;;  %v6575_v17 = vand.u32 4294901760, %v5278_v62  ;;  %v6580_v22 = vand.u32 4294901760, %v4671_v48 }
  0xe1   : > { %v5346_v63 = vsub.f32 %v4645_v10, %v6570_v21  ;;  %v731_v44 = vsub.f32 %v5267_v12, %v6573_v34  ;;  %v6576_v10 = vand.u32 4294901760, %v5283_v30  ;;  %v6577_v21 = vand.u32 4294901760, %v5288_v28 }
  0xe2   : > { %v725_v35 = vsub.f32 %v5272_v24, %v6574_v26  ;;  %v737_v33 = vsub.f32 %v5278_v62, %v6575_v17  ;;  %v702_v34 = vand.u32 4294901760, %v701_v8  ;;  %v6578_v17 = vand.u32 4294901760, %v4669_v43  ;;  %v6582_v8 = vld [vmem:[#allocation63_spill] sm:$0xff] }
  0xe3   : > { %6571 = vst [vmem:[#allocation105_spill] sm:$0xff] %v5346_v63  ;;  %v743_v52 = vsub.f32 %v5283_v30, %v6576_v10  ;;  %v755_v1 = vsub.f32 %v5288_v28, %v6577_v21  ;;  %v714_v10 = vand.u32 4294901760, %v713_v54  ;;  %v5382_v15 = vsub.f32 %v4671_v48, %v6580_v22  ;;  %v6585_v30 = vld [vmem:[#allocation64_spill] sm:$0xff] }
  0xe4   : > { %v5374_v62 = vsub.f32 %v4669_v43, %v6578_v17  ;;  %v6583_v26 = vand.u32 4294901760, %v6582_v8  ;;  %v720_v28 = vand.u32 4294901760, %v719_v6  ;;  %v732_v43 = vand.u32 4294901760, %v731_v44 }
  0xe5   : > { %6581 = vst [vmem:[#allocation107_spill] sm:$0xff] %v5382_v15  ;;  %v726_v17 = vand.u32 4294901760, %v725_v35  ;;  %v6586_v12 = vand.u32 4294901760, %v6585_v30  ;;  %v738_v54 = vand.u32 4294901760, %v737_v33  ;;  %v744_v21 = vand.u32 4294901760, %v743_v52 }
  0xe6   : > { %6579 = vst [vmem:[#allocation106_spill] sm:$0xff] %v5374_v62  ;;  %v5387_v24 = vsub.f32 %v6582_v8, %v6583_v26  ;;  %v756_v41 = vand.u32 4294901760, %v755_v1  ;;  %v6588_v61 = vand.u32 4294901760, %v5322_v49  ;;  %v6589_v22 = vand.u32 4294901760, %v5224_v55 }
  0xe7   : > { %v5392_v40 = vsub.f32 %v6585_v30, %v6586_v12  ;;  %v6590_v44 = vand.u32 4294901760, %v5331_v3  ;;  %v6591_v33 = vand.u32 4294901760, %v5336_v27  ;;  %v6592_v45 = vand.u32 4294901760, %v5236_v38 }
  0xe8   : > { %6584 = vst [vmem:[#allocation63_spill] sm:$0xff] %v5387_v24  ;;  %v5397_v48 = vsub.f32 %v5322_v49, %v6588_v61  ;;  %v3186_v6 = vpack.c.bf16 %v666_v53, %v6589_v22  ;;  %v6593_v53 = vand.u32 4294901760, %v5346_v63  ;;  %v6264_v52 = vand.u32 4294901760, %v5382_v15 }
  0xe9   : > { %6587 = vst [vmem:[#allocation64_spill] sm:$0xff] %v5392_v40  ;;  %v5406_v12 = vsub.f32 %v5331_v3, %v6590_v44  ;;  %v5411_v30 = vsub.f32 %v5336_v27, %v6591_v33  ;;  %v3188_v55 = vpack.c.bf16 %v684_v60, %v6592_v45  ;;  %v6263_v1 = vand.u32 4294901760, %v5387_v24 }
  0xea   : > { %v5421_v35 = vsub.f32 %v5346_v63, %v6593_v53  ;;  %v3190_v26 = vpack.c.bf16 %v690_v19, %v678_v2  ;;  %v3192_v8 = vpack.c.bf16 %v708_v23, %v696_v58  ;;  %v3194_v22 = vpack.c.bf16 %v714_v10, %v702_v34  ;;  %3187 = vmatpush1.bf16.msra.mxu0 %v3186_v6 }
  0xeb   : > { %v6262_v44 = vand.u32 4294901760, %v5392_v40  ;;  %v3196_v33 = vpack.c.bf16 %v732_v43, %v720_v28  ;;  %v5426_v61 = vpack.c.bf16 %v738_v54, %v726_v17  ;;  %v5428_v20 = vpack.c.bf16 %v756_v41, %v744_v21  ;;  %3571 = vmatpush1.bf16.msra.mxu1 %v3186_v6  ;;  %3189 = vmatprep.subr.bf16.mxu0 %v3188_v55  ;;  %v6600_v17 = vld [vmem:[#allocation69_spill] sm:$0xff] }
  0xec   : > { %v750_v38 = vand.u32 4294901760, %v5397_v48  ;;  %v762_v60 = vand.u32 4294901760, %v5406_v12  ;;  %v768_v45 = vand.u32 4294901760, %v5411_v30  ;;  %v6594_v53 = vand.u32 4294901760, %v5374_v62  ;;  %3573 = vmatprep.subr.bf16.mxu1 %v3188_v55  ;;  %v6602_v12 = vld [vmem:[#allocation89_spill] sm:$0xff]  ;;  %v6603_v30 = vld [vmem:[#allocation90_spill] sm:$0xff] }
  0xed   : > { %v6595_v19 = vand.u32 4294901760, %v4684_v32  ;;  %v780_v41 = vand.u32 4294901760, %v5421_v35  ;;  %v5447_v58 = vsub.f32 %v5382_v15, %v6264_v52  ;;  %v5452_v23 = vsub.f32 %v5387_v24, %v6263_v1  ;;  %v6607_v52 = vld [vmem:[#allocation71_spill] sm:$0xff] }
  0xee   : > { %v5436_v2 = vsub.f32 %v5374_v62, %v6594_v53  ;;  %v6596_v34 = vand.u32 4294901760, %v4702_v11  ;;  %v6598_v21 = vand.u32 4294901760, %v4704_v9  ;;  %v6601_v54 = vand.u32 4294901760, %v6600_v17  ;;  %3191 = vmatpush1.bf16.msra.mxu0 %v3190_v26 }
  0xef   : > { %v5441_v28 = vsub.f32 %v4684_v32, %v6595_v19  ;;  %v5462_v32 = vsub.f32 %v5392_v40, %v6262_v44  ;;  %v5476_v6 = vpack.c.bf16 %v4857_v4, %v4852_v13  ;;  %v5484_v55 = vpack.c.bf16 %v6603_v30, %v6602_v12  ;;  %3575 = vmatpush1.bf16.msra.mxu1 %v3190_v26  ;;  %v6604_v19 = vld [vmem:[#allocation70_spill] sm:$0xff] }
  0xf0   : > { %v5457_v10 = vsub.f32 %v4702_v11, %v6596_v34  ;;  %v5467_v43 = vsub.f32 %v4704_v9, %v6598_v21  ;;  %v5472_v48 = vsub.f32 %v6600_v17, %v6601_v54  ;;  %v5480_v11 = vpack.c.bf16 %v4867_v18, %v4862_v14  ;;  %3193 = vmatprep.subr.bf16.mxu0 %v3192_v8 }
  0xf1   : > { %v5488_v9 = vpack.c.bf16 %v4920_v37, %v4915_v5  ;;  %v5492_v35 = vpack.c.bf16 %v4994_v25, %v4966_v59  ;;  %v6605_v34 = vand.u32 4294901760, %v6604_v19  ;;  %v5502_v17 = vpack.c.bf16 %v5015_v16, %v5004_v42  ;;  %3577 = vmatprep.subr.bf16.mxu1 %v3192_v8  ;;  %v6609_v8 = vld [vmem:[#allocation24_spill] sm:$0xff]  ;;  %v6611_v16 = vld [vmem:[#allocation26_spill] sm:$0xff]  ;;  %v6621_v25 = vld [vmem:[#allocation49_spill] sm:$0xff] }
  0xf2   : > { %6597 = vst [vmem:[#allocation108_spill] sm:$0xff] %v5457_v10  ;;  %6599 = vst [vmem:[#allocation109_spill] sm:$0xff] %v5467_v43  ;;  %v5506_v54 = vpack.c.bf16 %v5035_v0, %v5030_v46  ;;  %v5511_v26 = vpack.c.bf16 %v5048_v47, %v5040_v31  ;;  %v6608_v53 = vand.u32 4294901760, %v6607_v52  ;;  %v6610_v46 = vld [vmem:[#allocation25_spill] sm:$0xff]  ;;  %v6612_v47 = vld [vmem:[#allocation27_spill] sm:$0xff]  ;;  %3195 = vmatpush1.bf16.msra.mxu0 %v3194_v22 }
  0xf3   : > { %v5498_v21 = vsub.f32 %v6604_v19, %v6605_v34  ;;  %v5515_v19 = vpack.c.bf16 %v5058_v51, %v5053_v50  ;;  %v6606_v34 = vld [vmem:[#allocation23_spill] sm:$0xff]  ;;  %v5528_v44 = vpack.c.bf16 %v6610_v46, %v6609_v8  ;;  %v5532_v31 = vpack.c.bf16 %v6612_v47, %v6611_v16  ;;  %v6616_v8 = vld [vmem:[#allocation40_spill] sm:$0xff]  ;;  %3579 = vmatpush1.bf16.msra.mxu1 %v3194_v22  ;;  %v6619_v16 = vld [vmem:[#allocation46_spill] sm:$0xff] }
  0xf4   : > { %v5519_v1 = vpack.c.bf16 %v6606_v34, %v5064_v57  ;;  %v5524_v0 = vsub.f32 %v6607_v52, %v6608_v53  ;;  %v5536_v51 = vpack.c.bf16 %v5171_v29, %v5164_v7  ;;  %v5540_v34 = vpack.c.bf16 %v5183_v56, %v5176_v39  ;;  %v6613_v57 = vld [vmem:[#allocation35_spill] sm:$0xff]  ;;  %v6614_v53 = vld [vmem:[#allocation38_spill] sm:$0xff]  ;;  %v6617_v42 = vld [vmem:[#allocation44_spill] sm:$0xff]  ;;  %3197 = vmatprep.subr.bf16.mxu0 %v3196_v33 }
  0xf5   : > { %v5544_v52 = vpack.c.bf16 %v6613_v57, %v5193_v36  ;;  %v6615_v50 = vld [vmem:[#allocation39_spill] sm:$0xff]  ;;  %v5552_v47 = vpack.c.bf16 %v6617_v42, %v6616_v8  ;;  %v6618_v7 = vld [vmem:[#allocation45_spill] sm:$0xff]  ;;  %v6620_v39 = vld [vmem:[#allocation48_spill] sm:$0xff]  ;;  %3581 = vmatprep.subr.bf16.mxu1 %v3196_v33  ;;  %v5570_v22 = vpack.c.bf16 %v5331_v3, %v5322_v49  ;;  %v5574_v29 = vpack.c.bf16 %v5346_v63, %v5336_v27 }
  0xf6   : > { %v5548_v46 = vpack.c.bf16 %v6615_v50, %v6614_v53  ;;  %v5557_v56 = vpack.c.bf16 %v6619_v16, %v6618_v7  ;;  %v5561_v57 = vpack.c.bf16 %v6621_v25, %v6620_v39  ;;  %v6622_v36 = vld [vmem:[#allocation51_spill] sm:$0xff]  ;;  %v6623_v59 = vld [vmem:[#allocation52_spill] sm:$0xff]  ;;  %v5578_v25 = vpack.c.bf16 %v5382_v15, %v5374_v62  ;;  %3199 = vmatpush1.bf16.msra.mxu0 %v5426_v61 }
  0xf7   : > { %v5565_v50 = vpack.c.bf16 %v6623_v59, %v6622_v36  ;;  %v5582_v59 = vpack.c.bf16 %v5392_v40, %v5387_v24  ;;  %v5586_v33 = vpack.c.bf16 %v5457_v10, %v5441_v28  ;;  %v5590_v42 = vpack.c.bf16 %v5472_v48, %v5467_v43  ;;  %3583 = vmatpush1.bf16.msra.mxu1 %v5426_v61 }
  0xf8   : > { %v5594_v63 = vpack.c.bf16 %v5524_v0, %v5498_v21  ;;  %v3202_v27 = vpack.c.bf16 %v762_v60, %v750_v38  ;;  %v3204_v3 = vpack.c.bf16 %v780_v41, %v768_v45  ;;  %v774_v15 = vand.u32 4294901760, %v5436_v2  ;;  %3201 = vmatprep.subr.bf16.mxu0 %v5428_v20  ;;  %3585 = vmatprep.subr.bf16.mxu1 %v5428_v20 }
  0xf9   : > { %v786_v62 = vand.u32 4294901760, %v5447_v58  ;;  %v6624_v40 = vand.u32 4294901760, %v5441_v28  ;;  %v6625_v49 = vand.u32 4294901760, %v5457_v10  ;;  %v6291_v39 = vand.u32 4294901760, %v5498_v21 }
  0xfa   : > { %v792_v60 = vand.u32 4294901760, %v5452_v23  ;;  %v804_v61 = vand.u32 4294901760, %v5462_v32  ;;  %v6626_v45 = vand.u32 4294901760, %v5467_v43  ;;  %v6627_v2 = vand.u32 4294901760, %v5472_v48  ;;  %3203 = vmatpush1.bf16.msra.mxu0 %v3202_v27 }
  0xfb   : > { %v797_v24 = vsub.f32 %v5441_v28, %v6624_v40  ;;  %v809_v36 = vsub.f32 %v5457_v10, %v6625_v49  ;;  %v3206_v41 = vpack.c.bf16 %v786_v62, %v774_v15  ;;  %3587 = vmatpush1.bf16.msra.mxu1 %v3202_v27  ;;  %v821_v20 = vsub.f32 %v5498_v21, %v6291_v39 }
  0xfc   : > { %v815_v40 = vsub.f32 %v5467_v43, %v6626_v45  ;;  %v827_v49 = vsub.f32 %v5472_v48, %v6627_v2  ;;  %v6628_v23 = vand.u32 4294901760, %v5524_v0  ;;  %3205 = vmatprep.subr.bf16.mxu0 %v3204_v3  ;;  %3589 = vmatprep.subr.bf16.mxu1 %v3204_v3  ;;  %v3208_v45 = vpack.c.bf16 %v804_v61, %v792_v60  ;;  %v6629_v2 = vld [vmem:[#allocation59_spill] sm:$0xff]  ;;  %v6631_v3 = vld [vmem:[#allocation72_spill] sm:$0xff]  ;;  %v6632_v60 = vld [vmem:[#allocation74_spill] sm:$0xff] }
  0xfd   : > { %v798_v58 = vand.u32 4294901760, %v797_v24  ;;  %v810_v38 = vand.u32 4294901760, %v809_v36  ;;  %v822_v15 = vand.u32 4294901760, %v821_v20  ;;  %v3218_v61 = vpack.c.bf16 %v6632_v60, %v6631_v3 }
  0xfe   : > { %v833_v32 = vsub.f32 %v5524_v0, %v6628_v23  ;;  %v816_v43 = vand.u32 4294901760, %v815_v40  ;;  %v828_v10 = vand.u32 4294901760, %v827_v49  ;;  %3207 = vmatpush1.bf16.msra.mxu0 %v3206_v41  ;;  %v6630_v23 = vld [vmem:[#allocation65_spill] sm:$0xff]  ;;  %v6634_v40 = vld [vmem:[#allocation84_spill] sm:$0xff] }
  0xff   : > { %3591 = vmatpush1.bf16.msra.mxu1 %v3206_v41  ;;  %v3210_v62 = vpack.c.bf16 %v810_v38, %v798_v58  ;;  %3209 = vmatprep.subr.bf16.mxu0 %v3208_v45  ;;  %v3216_v39 = vpack.c.bf16 %v6630_v23, %v6629_v2  ;;  %v6633_v38 = vld [vmem:[#allocation82_spill] sm:$0xff]  ;;  %v6635_v41 = vld [vmem:[#allocation68_spill] sm:$0xff] }
 0x100   : > { %v834_v27 = vand.u32 4294901760, %v833_v32  ;;  %3593 = vmatprep.subr.bf16.mxu1 %v3208_v45  ;;  %v3212_v24 = vpack.c.bf16 %v828_v10, %v816_v43  ;;  %v3220_v49 = vpack.c.bf16 %v6634_v40, %v6633_v38  ;;  %v6636_v10 = vld [vmem:[#allocation83_spill] sm:$0xff]  ;;  %v6637_v43 = vld [vmem:[#allocation85_spill] sm:$0xff]  ;;  %v6638_v58 = vld [vmem:[#allocation86_spill] sm:$0xff] }
 0x101   : > { %v3222_v20 = vpack.c.bf16 %v6638_v58, %v6637_v43  ;;  %v6639_v32 = vld [vmem:[#allocation87_spill] sm:$0xff]  ;;  %v6640_v45 = vld [vmem:[#allocation88_spill] sm:$0xff] }
 0x102   : > { %3211 = vmatpush1.bf16.msra.mxu0 %v3210_v62  ;;  %v3214_v36 = vpack.c.bf16 %v834_v27, %v822_v15  ;;  %v6641_v15 = vld [vmem:[#allocation53_spill] sm:$0xff]  ;;  %v6670_v27 = vld [vmem:[#allocation62_spill] sm:$0xff] }
 0x103   : > { %3595 = vmatpush1.bf16.msra.mxu1 %v3210_v62  ;;  %3213 = vmatprep.subr.bf16.mxu0 %v3212_v24  ;;  %v3224_v62 = vpack.c.bf16 %v6640_v45, %v6639_v32 }
 0x104   : > { %3597 = vmatprep.subr.bf16.mxu1 %v3212_v24  ;;  %v6671_v24 = vld [vmem:[#allocation67_spill] sm:$0xff] }
 0x106   : > { %3215 = vmatpush1.bf16.msra.mxu0 %v3214_v36 }
 0x107   : > { %3599 = vmatpush1.bf16.msra.mxu1 %v3214_v36  ;;  %3217 = vmatprep.subr.bf16.mxu0 %v3216_v39  ;;  %v6672_v36 = vld [vmem:[#allocation75_spill] sm:$0xff] }
 0x108   : > { %3601 = vmatprep.subr.bf16.mxu1 %v3216_v39  ;;  %v6642_v39 = vld [vmem:[#allocation66_spill] sm:$0xff] }
 0x109   : > { %839 = vmatmul.mubr.f32.vlgmr.msra.gmra.mrb[0].mxu0 %v6635_v41 }
 0x10a   : > { %2125 = vmatmul.mubr.f32.vlgmr.msra.gmra.mrb[0].mxu1 %v6636_v10  ;;  %3219 = vmatpush1.bf16.msra.mxu0 %v3218_v61 }
 0x10b   : > { %3603 = vmatpush1.bf16.msra.mxu1 %v3218_v61  ;;  %3221 = vmatprep.subr.bf16.mxu0 %v3220_v49  ;;  %v6673_v61 = vld [vmem:[#allocation76_spill] sm:$0xff] }
 0x10c   : > { %3605 = vmatprep.subr.bf16.mxu1 %v3220_v49  ;;  %1039 = vmatprep.mubr.f32.mxu0 %v6641_v15  ;;  %v6674_v49 = vld [vmem:[#allocation77_spill] sm:$0xff] }
 0x10d   : > { %2325 = vmatprep.mubr.f32.mxu1 %v6642_v39 }
 0x10e   : > { %3223 = vmatpush1.bf16.msra.mxu0 %v3222_v20 }
 0x10f   : > { %3607 = vmatpush1.bf16.msra.mxu1 %v3222_v20  ;;  %3225 = vmatprep.subr.bf16.mxu0 %v3224_v62  ;;  %v6675_v20 = vld [vmem:[#allocation78_spill] sm:$0xff] }
 0x110   : > { %3609 = vmatprep.subr.bf16.mxu1 %v3224_v62  ;;  %v6676_v62 = vld [vmem:[#allocation79_spill] sm:$0xff] }
 0x112   : > { %3227 = vmatpush1.bf16.msra.mxu0 %v5476_v6 }
 0x113   : > { %3611 = vmatpush1.bf16.msra.mxu1 %v5476_v6  ;;  %3229 = vmatprep.subr.bf16.mxu0 %v5480_v11  ;;  %v6657_v6 = vld [vmem:[#allocation29_spill] sm:$0xff] }
 0x114   : > { %3613 = vmatprep.subr.bf16.mxu1 %v5480_v11  ;;  %v6658_v11 = vld [vmem:[#allocation36_spill] sm:$0xff] }
 0x116   : > { %3231 = vmatpush1.bf16.msra.mxu0 %v5484_v55 }
 0x117   : > { %3615 = vmatpush1.bf16.msra.mxu1 %v5484_v55  ;;  %3233 = vmatprep.subr.bf16.mxu0 %v5488_v9  ;;  %v6659_v55 = vld [vmem:[#allocation37_spill] sm:$0xff] }
 0x118   : > { %3617 = vmatprep.subr.bf16.mxu1 %v5488_v9  ;;  %v6660_v9 = vld [vmem:[#allocation41_spill] sm:$0xff] }
 0x11a   : > { %3235 = vmatpush1.bf16.msra.mxu0 %v5492_v35 }
 0x11b   : > { %3619 = vmatpush1.bf16.msra.mxu1 %v5492_v35  ;;  %3237 = vmatprep.subr.bf16.mxu0 %v5502_v17  ;;  %v6661_v35 = vld [vmem:[#allocation42_spill] sm:$0xff] }
 0x11c   : > { %3621 = vmatprep.subr.bf16.mxu1 %v5502_v17  ;;  %v6662_v17 = vld [vmem:[#allocation43_spill] sm:$0xff] }
 0x11e   : > { %3239 = vmatpush1.bf16.msra.mxu0 %v5506_v54 }
 0x11f   : > { %3623 = vmatpush1.bf16.msra.mxu1 %v5506_v54  ;;  %3241 = vmatprep.subr.bf16.mxu0 %v5511_v26  ;;  %v6663_v54 = vld [vmem:[#allocation47_spill] sm:$0xff] }
 0x120   : > { %3625 = vmatprep.subr.bf16.mxu1 %v5511_v26  ;;  %v6664_v26 = vld [vmem:[#allocation54_spill] sm:$0xff] }
 0x122   : > { %3243 = vmatpush1.bf16.msra.mxu0 %v5515_v19 }
 0x123   : > { %3627 = vmatpush1.bf16.msra.mxu1 %v5515_v19  ;;  %3245 = vmatprep.subr.bf16.mxu0 %v5519_v1  ;;  %v6665_v19 = vld [vmem:[#allocation55_spill] sm:$0xff] }
 0x124   : > { %3629 = vmatprep.subr.bf16.mxu1 %v5519_v1  ;;  %v6655_v1 = vld [vmem:[#allocation22_spill] sm:$0xff] }
 0x126   : > { %3247 = vmatpush1.bf16.msra.mxu0 %v5528_v44 }
 0x127   : > { %3631 = vmatpush1.bf16.msra.mxu1 %v5528_v44  ;;  %3249 = vmatprep.subr.bf16.mxu0 %v5532_v31  ;;  %v6656_v44 = vld [vmem:[#allocation28_spill] sm:$0xff] }
 0x128   : > { %3633 = vmatprep.subr.bf16.mxu1 %v5532_v31  ;;  %v6647_v31 = vld [vmem:[#allocation15_spill] sm:$0xff] }
 0x12a   : > { %3251 = vmatpush1.bf16.msra.mxu0 %v5536_v51 }
 0x12b   : > { %3635 = vmatpush1.bf16.msra.mxu1 %v5536_v51  ;;  %3253 = vmatprep.subr.bf16.mxu0 %v5540_v34  ;;  %v6651_v51 = vld [vmem:[#allocation17_spill] sm:$0xff] }
 0x12c   : > { %3637 = vmatprep.subr.bf16.mxu1 %v5540_v34  ;;  %v6666_v34 = vld [vmem:[#allocation56_spill] sm:$0xff] }
 0x12e   : > { %3255 = vmatpush1.bf16.msra.mxu0 %v5544_v52 }
 0x12f   : > { %3639 = vmatpush1.bf16.msra.mxu1 %v5544_v52  ;;  %3257 = vmatprep.subr.bf16.mxu0 %v5548_v46  ;;  %v6667_v52 = vld [vmem:[#allocation57_spill] sm:$0xff] }
 0x130   : > { %3641 = vmatprep.subr.bf16.mxu1 %v5548_v46  ;;  %v6645_v46 = vld [vmem:[#allocation91_spill] sm:$0xff] }
 0x132   : > { %3259 = vmatpush1.bf16.msra.mxu0 %v5552_v47 }
 0x133   : > { %3643 = vmatpush1.bf16.msra.mxu1 %v5552_v47  ;;  %3261 = vmatprep.subr.bf16.mxu0 %v5557_v56  ;;  %v6649_v47 = vand.u32 4294901760, %v6642_v39  ;;  %v6678_v39 = vand.u32 4294901760, %v6629_v2 }
 0x134   : > { %3645 = vmatprep.subr.bf16.mxu1 %v5557_v56  ;;  %v6653_v56 = vld [vmem:[#allocation19_spill] sm:$0xff] }
 0x136   : > { %3263 = vmatpush1.bf16.msra.mxu0 %v5561_v57 }
 0x137   : > { %3647 = vmatpush1.bf16.msra.mxu1 %v5561_v57  ;;  %3265 = vmatprep.subr.bf16.mxu0 %v5565_v50  ;;  %v6652_v57 = vld [vmem:[#allocation18_spill] sm:$0xff] }
 0x138   : > { %3649 = vmatprep.subr.bf16.mxu1 %v5565_v50  ;;  %v6650_v50 = vld [vmem:[#allocation16_spill] sm:$0xff] }
 0x13a   : > { %3267 = vmatpush1.bf16.msra.mxu0 %v5570_v22 }
 0x13b   : > { %3651 = vmatpush1.bf16.msra.mxu1 %v5570_v22  ;;  %3269 = vmatprep.subr.bf16.mxu0 %v5574_v29  ;;  %v6668_v22 = vld [vmem:[#allocation58_spill] sm:$0xff] }
 0x13c   : > { %3653 = vmatprep.subr.bf16.mxu1 %v5574_v29  ;;  %v6643_v29 = vld [vmem:[#allocation13_spill] sm:$0xff] }
 0x13e   : > { %3271 = vmatpush1.bf16.msra.mxu0 %v5578_v25 }
 0x13f   : > { %3655 = vmatpush1.bf16.msra.mxu1 %v5578_v25  ;;  %3273 = vmatprep.subr.bf16.mxu0 %v5582_v59  ;;  %v6644_v25 = vld [vmem:[#allocation73_spill] sm:$0xff] }
 0x140   : > { %3657 = vmatprep.subr.bf16.mxu1 %v5582_v59  ;;  %v6646_v59 = vld [vmem:[#allocation14_spill] sm:$0xff]  ;;  %v6685_v2 = vand.u32 4294901760, %v6644_v25 }
 0x142   : > { %3275 = vmatpush1.bf16.msra.mxu0 %v5586_v33 }
 0x143   : > { %3659 = vmatpush1.bf16.msra.mxu1 %v5586_v33  ;;  %3277 = vmatprep.subr.bf16.mxu0 %v5590_v42  ;;  %v6669_v33 = vld [vmem:[#allocation61_spill] sm:$0xff] }
 0x144   : > { %3661 = vmatprep.subr.bf16.mxu1 %v5590_v42  ;;  %v6648_v42 = vand.u32 4294901760, %v6641_v15  ;;  %v6677_v15 = vld [vmem:[#allocation80_spill] sm:$0xff] }
 0x146   : > { %3279 = vmatpush1.bf16.msra.mxu0 %v5594_v63 }
 0x147   : > { %3663 = vmatpush1.bf16.msra.mxu1 %v5594_v63  ;;  %3281 = vmatprep.subr.bf16.mxu0 %v6643_v29  ;;  %v6654_v63 = vld [vmem:[#allocation20_spill] sm:$0xff] }
 0x148   : > { %3665 = vmatprep.subr.bf16.mxu1 %v6643_v29 }
 0x149   : > { %1042 = vmatmul.mubr.f32.vlgmr.msra.gmra.mrb[0].mxu0 %v6644_v25  ;;  %v6692_v25 = vld [vmem:[#allocation60_spill] sm:$0xff] }
 0x14a   : > { %2328 = vmatmul.mubr.f32.vlgmr.msra.gmra.mrb[0].mxu1 %v6645_v46  ;;  %3283 = vmatpush1.bf16.msra.mxu0 %v6646_v59 }
 0x14b   : > { %3667 = vmatpush1.bf16.msra.mxu1 %v6646_v59  ;;  %3285 = vmatprep.subr.bf16.mxu0 %v6647_v31 }
 0x14c   : > { %3669 = vmatprep.subr.bf16.mxu1 %v6647_v31  ;;  %1179 = vmatprep.mubr.f32.mxu0 %v6648_v42  ;;  %v6679_v42 = vand.u32 4294901760, %v6630_v23  ;;  %v6686_v23 = vand.u32 4294901760, %v6645_v46  ;;  %v6693_v46 = vand.u32 4294901760, %v4852_v13  ;;  %v6699_v13 = vand.u32 4294901760, %v4915_v5  ;;  %v6709_v5 = vld [vmem:[#allocation96_spill] sm:$0xff] }
 0x14d   : > { %2465 = vmatprep.mubr.f32.mxu1 %v6649_v47 }
 0x14e   : > { %3287 = vmatpush1.bf16.msra.mxu0 %v6650_v50  ;;  %v3344_v47 = vpack.c.bf16 %v6679_v42, %v6678_v39 }
 0x14f   : > { %3671 = vmatpush1.bf16.msra.mxu1 %v6650_v50  ;;  %3289 = vmatprep.subr.bf16.mxu0 %v6651_v51 }
 0x150   : > { %3673 = vmatprep.subr.bf16.mxu1 %v6651_v51 }
 0x152   : > { %3291 = vmatpush1.bf16.msra.mxu0 %v6652_v57 }
 0x153   : > { %3675 = vmatpush1.bf16.msra.mxu1 %v6652_v57  ;;  %3293 = vmatprep.subr.bf16.mxu0 %v6653_v56 }
 0x154   : > { %3677 = vmatprep.subr.bf16.mxu1 %v6653_v56 }
 0x156   : > { %3295 = vmatpush1.bf16.msra.mxu0 %v6654_v63 }
 0x157   : > { %3679 = vmatpush1.bf16.msra.mxu1 %v6654_v63  ;;  %3297 = vmatprep.subr.bf16.mxu0 %v6655_v1 }
 0x158   : > { %3681 = vmatprep.subr.bf16.mxu1 %v6655_v1 }
 0x15a   : > { %3299 = vmatpush1.bf16.msra.mxu0 %v6656_v44 }
 0x15b   : > { %3683 = vmatpush1.bf16.msra.mxu1 %v6656_v44  ;;  %3301 = vmatprep.subr.bf16.mxu0 %v6657_v6 }
 0x15c   : > { %3685 = vmatprep.subr.bf16.mxu1 %v6657_v6 }
 0x15e   : > { %3303 = vmatpush1.bf16.msra.mxu0 %v6658_v11 }
 0x15f   : > { %3687 = vmatpush1.bf16.msra.mxu1 %v6658_v11  ;;  %3305 = vmatprep.subr.bf16.mxu0 %v6659_v55 }
 0x160   : > { %3689 = vmatprep.subr.bf16.mxu1 %v6659_v55 }
 0x162   : > { %3307 = vmatpush1.bf16.msra.mxu0 %v6660_v9 }
 0x163   : > { %3691 = vmatpush1.bf16.msra.mxu1 %v6660_v9  ;;  %3309 = vmatprep.subr.bf16.mxu0 %v6661_v35 }
 0x164   : > { %3693 = vmatprep.subr.bf16.mxu1 %v6661_v35 }
 0x166   : > { %3311 = vmatpush1.bf16.msra.mxu0 %v6662_v17 }
 0x167   : > { %3695 = vmatpush1.bf16.msra.mxu1 %v6662_v17  ;;  %3313 = vmatprep.subr.bf16.mxu0 %v6663_v54 }
 0x168   : > { %3697 = vmatprep.subr.bf16.mxu1 %v6663_v54 }
 0x16a   : > { %3315 = vmatpush1.bf16.msra.mxu0 %v6664_v26 }
 0x16b   : > { %3699 = vmatpush1.bf16.msra.mxu1 %v6664_v26  ;;  %3317 = vmatprep.subr.bf16.mxu0 %v6665_v19 }
 0x16c   : > { %3701 = vmatprep.subr.bf16.mxu1 %v6665_v19 }
 0x16e   : > { %3319 = vmatpush1.bf16.msra.mxu0 %v6666_v34 }
 0x16f   : > { %3703 = vmatpush1.bf16.msra.mxu1 %v6666_v34  ;;  %3321 = vmatprep.subr.bf16.mxu0 %v6667_v52 }
 0x170   : > { %3705 = vmatprep.subr.bf16.mxu1 %v6667_v52 }
 0x172   : > { %3323 = vmatpush1.bf16.msra.mxu0 %v6668_v22 }
 0x173   : > { %3707 = vmatpush1.bf16.msra.mxu1 %v6668_v22  ;;  %3325 = vmatprep.subr.bf16.mxu0 %v6669_v33 }
 0x174   : > { %3709 = vmatprep.subr.bf16.mxu1 %v6669_v33 }
 0x176   : > { %3327 = vmatpush1.bf16.msra.mxu0 %v6670_v27 }
 0x177   : > { %3711 = vmatpush1.bf16.msra.mxu1 %v6670_v27  ;;  %3329 = vmatprep.subr.bf16.mxu0 %v6671_v24 }
 0x178   : > { %3713 = vmatprep.subr.bf16.mxu1 %v6671_v24 }
 0x17a   : > { %3331 = vmatpush1.bf16.msra.mxu0 %v6672_v36 }
 0x17b   : > { %3715 = vmatpush1.bf16.msra.mxu1 %v6672_v36  ;;  %3333 = vmatprep.subr.bf16.mxu0 %v6673_v61 }
 0x17c   : > { %3717 = vmatprep.subr.bf16.mxu1 %v6673_v61  ;;  %v6680_v61 = vld [vmem:[#allocation81_spill] sm:$0xff] }
 0x17e   : > { %3335 = vmatpush1.bf16.msra.mxu0 %v6674_v49 }
 0x17f   : > { %3719 = vmatpush1.bf16.msra.mxu1 %v6674_v49  ;;  %3337 = vmatprep.subr.bf16.mxu0 %v6675_v20  ;;  %v6681_v49 = vand.u32 4294901760, %v6631_v3  ;;  %v6687_v3 = vand.u32 4294901760, %v6637_v43  ;;  %v6694_v43 = vand.u32 4294901760, %v4857_v4  ;;  %v6700_v4 = vand.u32 4294901760, %v4920_v37  ;;  %v6711_v37 = vld [vmem:[#allocation97_spill] sm:$0xff] }
 0x180   : > { %3721 = vmatprep.subr.bf16.mxu1 %v6675_v20  ;;  %v6682_v20 = vand.u32 4294901760, %v6632_v60  ;;  %v6688_v60 = vand.u32 4294901760, %v6638_v58  ;;  %v6695_v58 = vand.u32 4294901760, %v4862_v14  ;;  %v6701_v14 = vld [vmem:[#allocation92_spill] sm:$0xff] }
 0x181   : > { %v3360_v42 = vpack.c.bf16 %v6700_v4, %v6699_v13  ;;  %v6721_v4 = vld [vmem:[#allocation21_spill] sm:$0xff] }
 0x182   : > { %3339 = vmatpush1.bf16.msra.mxu0 %v6676_v62  ;;  %v3346_v36 = vpack.c.bf16 %v6682_v20, %v6681_v49  ;;  %v3350_v49 = vpack.c.bf16 %v6688_v60, %v6687_v3 }
 0x183   : > { %3723 = vmatpush1.bf16.msra.mxu1 %v6676_v62  ;;  %3341 = vmatprep.subr.bf16.mxu0 %v6677_v15  ;;  %v6683_v62 = vand.u32 4294901760, %v6633_v38  ;;  %v6689_v38 = vand.u32 4294901760, %v6639_v32  ;;  %v6696_v32 = vand.u32 4294901760, %v4867_v18  ;;  %v6703_v18 = vld [vmem:[#allocation93_spill] sm:$0xff] }
 0x184   : > { %3725 = vmatprep.subr.bf16.mxu1 %v6677_v15  ;;  %v6684_v15 = vand.u32 4294901760, %v6634_v40  ;;  %v6690_v40 = vand.u32 4294901760, %v6640_v45  ;;  %v6697_v45 = vand.u32 4294901760, %v6602_v12  ;;  %v6705_v12 = vld [vmem:[#allocation94_spill] sm:$0xff] }
 0x185   : > { %v6706_v3 = vand.u32 4294901760, %v6705_v12  ;;  %v6727_v12 = vld [vmem:[#allocation25_spill] sm:$0xff] }
 0x186   : > { %3343 = vmatpush1.bf16.msra.mxu0 %v6680_v61  ;;  %v3348_v24 = vpack.c.bf16 %v6684_v15, %v6683_v62  ;;  %v3352_v20 = vpack.c.bf16 %v6690_v40, %v6689_v38  ;;  %v6691_v62 = vld [vmem:[#allocation50_spill] sm:$0xff]  ;;  %v6698_v15 = vand.u32 4294901760, %v6603_v30  ;;  %v6707_v30 = vld [vmem:[#allocation95_spill] sm:$0xff]  ;;  %v6710_v38 = vand.u32 4294901760, %v6709_v5 }
 0x187   : > { %3727 = vmatpush1.bf16.msra.mxu1 %v6680_v61  ;;  %3345 = vmatprep.subr.bf16.mxu0 %v3344_v47  ;;  %v6708_v60 = vand.u32 4294901760, %v6707_v30  ;;  %v6712_v40 = vand.u32 4294901760, %v6711_v37  ;;  %v6731_v5 = vld [vmem:[#allocation27_spill] sm:$0xff] }
 0x188   : > { %3729 = vmatprep.subr.bf16.mxu1 %v3344_v47  ;;  %v3358_v39 = vpack.c.bf16 %v6698_v15, %v6697_v45  ;;  %v6702_v47 = vand.u32 4294901760, %v6701_v14  ;;  %v6719_v15 = vld [vmem:[#allocation101_spill] sm:$0xff]  ;;  %v6723_v14 = vld [vmem:[#allocation23_spill] sm:$0xff] }
 0x189   : > { %1183 = vmatmul.mubr.f32.vlgmr.msra.gmra.mrb[0].mxu0 %v6685_v2  ;;  %v6704_v2 = vand.u32 4294901760, %v6703_v18 }
 0x18a   : > { %2469 = vmatmul.mubr.f32.vlgmr.msra.gmra.mrb[0].mxu1 %v6686_v23  ;;  %3347 = vmatpush1.bf16.msra.mxu0 %v3346_v36 }
 0x18b   : > { %3731 = vmatpush1.bf16.msra.mxu1 %v3346_v36  ;;  %3349 = vmatprep.subr.bf16.mxu0 %v3348_v24  ;;  %v3354_v36 = vpack.c.bf16 %v6694_v43, %v6693_v46  ;;  %v3362_v23 = vpack.c.bf16 %v6704_v2, %v6702_v47  ;;  %v6713_v46 = vld [vmem:[#allocation98_spill] sm:$0xff]  ;;  %v6724_v47 = vand.u32 4294901760, %v6723_v14  ;;  %v6725_v2 = vld [vmem:[#allocation24_spill] sm:$0xff] }
 0x18c   : > { %3733 = vmatprep.subr.bf16.mxu1 %v3348_v24  ;;  %1446 = vmatprep.mubr.f32.mxu0 %v6691_v62  ;;  %v3356_v24 = vpack.c.bf16 %v6696_v32, %v6695_v58  ;;  %v6714_v43 = vand.u32 4294901760, %v6713_v46  ;;  %v6735_v46 = vld [vmem:[#allocation31_spill] sm:$0xff] }
 0x18d   : > { %2732 = vmatprep.mubr.f32.mxu1 %v6692_v25 }
 0x18e   : > { %3351 = vmatpush1.bf16.msra.mxu0 %v3350_v49 }
 0x18f   : > { %3735 = vmatpush1.bf16.msra.mxu1 %v3350_v49  ;;  %3353 = vmatprep.subr.bf16.mxu0 %v3352_v20  ;;  %v3364_v49 = vpack.c.bf16 %v6708_v60, %v6706_v3  ;;  %v6728_v3 = vand.u32 4294901760, %v6727_v12  ;;  %v6729_v60 = vld [vmem:[#allocation26_spill] sm:$0xff]  ;;  %v6748_v12 = vand.u32 4294901760, %v6616_v8  ;;  %v6757_v8 = vld [vmem:[#allocation51_spill] sm:$0xff] }
 0x190   : > { %3737 = vmatprep.subr.bf16.mxu1 %v3352_v20  ;;  %v3366_v20 = vpack.c.bf16 %v6712_v40, %v6710_v38  ;;  %v6732_v38 = vand.u32 4294901760, %v6731_v5  ;;  %v6733_v40 = vld [vmem:[#allocation30_spill] sm:$0xff]  ;;  %v6752_v5 = vand.u32 4294901760, %v6619_v16  ;;  %v6763_v16 = vld [vmem:[#allocation103_spill] sm:$0xff] }
 0x192   : > { %3355 = vmatpush1.bf16.msra.mxu0 %v3354_v36 }
 0x193   : > { %3739 = vmatpush1.bf16.msra.mxu1 %v3354_v36  ;;  %3357 = vmatprep.subr.bf16.mxu0 %v3356_v24  ;;  %v6715_v36 = vld [vmem:[#allocation99_spill] sm:$0xff] }
 0x194   : > { %3741 = vmatprep.subr.bf16.mxu1 %v3356_v24  ;;  %v6716_v58 = vand.u32 4294901760, %v6715_v36  ;;  %v6717_v24 = vld [vmem:[#allocation100_spill] sm:$0xff] }
 0x195   : > { %v6718_v45 = vand.u32 4294901760, %v6717_v24  ;;  %v6739_v24 = vld [vmem:[#allocation33_spill] sm:$0xff] }
 0x196   : > { %3359 = vmatpush1.bf16.msra.mxu0 %v3358_v39  ;;  %v3368_v32 = vpack.c.bf16 %v6716_v58, %v6714_v43  ;;  %v6736_v43 = vand.u32 4294901760, %v6735_v46  ;;  %v6737_v58 = vld [vmem:[#allocation32_spill] sm:$0xff] }
 0x197   : > { %3743 = vmatpush1.bf16.msra.mxu1 %v3358_v39  ;;  %3361 = vmatprep.subr.bf16.mxu0 %v3360_v42  ;;  %v6720_v39 = vand.u32 4294901760, %v6719_v15 }
 0x198   : > { %3745 = vmatprep.subr.bf16.mxu1 %v3360_v42  ;;  %v6722_v42 = vand.u32 4294901760, %v6721_v4  ;;  %v6743_v4 = vld [vmem:[#allocation35_spill] sm:$0xff] }
 0x199   : > { %v3370_v13 = vpack.c.bf16 %v6720_v39, %v6718_v45  ;;  %v6740_v45 = vand.u32 4294901760, %v6739_v24  ;;  %v6741_v39 = vld [vmem:[#allocation34_spill] sm:$0xff] }
 0x19a   : > { %3363 = vmatpush1.bf16.msra.mxu0 %v3362_v23  ;;  %v3372_v18 = vpack.c.bf16 %v6724_v47, %v6722_v42  ;;  %v6744_v42 = vand.u32 4294901760, %v6743_v4  ;;  %v6745_v47 = vand.u32 4294901760, %v6614_v53  ;;  %v6753_v53 = vld [vmem:[#allocation48_spill] sm:$0xff]  ;;  %v6767_v4 = vld [vmem:[#allocation105_spill] sm:$0xff] }
 0x19b   : > { %3747 = vmatpush1.bf16.msra.mxu1 %v3362_v23  ;;  %3365 = vmatprep.subr.bf16.mxu0 %v3364_v49  ;;  %v6726_v23 = vand.u32 4294901760, %v6725_v2 }
 0x19c   : > { %3749 = vmatprep.subr.bf16.mxu1 %v3364_v49  ;;  %v6730_v49 = vand.u32 4294901760, %v6729_v60 }
 0x19d   : > { %v3374_v30 = vpack.c.bf16 %v6728_v3, %v6726_v23  ;;  %v6749_v3 = vld [vmem:[#allocation44_spill] sm:$0xff] }
 0x19e   : > { %3367 = vmatpush1.bf16.msra.mxu0 %v3366_v20  ;;  %v3376_v37 = vpack.c.bf16 %v6732_v38, %v6730_v49  ;;  %v6751_v49 = vand.u32 4294901760, %v6618_v7  ;;  %v6761_v7 = vld [vmem:[#allocation102_spill] sm:$0xff] }
 0x19f   : > { %3751 = vmatpush1.bf16.msra.mxu1 %v3366_v20  ;;  %3369 = vmatprep.subr.bf16.mxu0 %v3368_v32  ;;  %v6734_v20 = vand.u32 4294901760, %v6733_v40  ;;  %v6755_v40 = vld [vmem:[#allocation49_spill] sm:$0xff]  ;;  %v6762_v24 = vand.u32 4294901760, %v6761_v7 }
 0x1a0   : > { %3753 = vmatprep.subr.bf16.mxu1 %v3368_v32  ;;  %v6738_v32 = vand.u32 4294901760, %v6737_v58  ;;  %v3388_v38 = vpack.c.bf16 %v6752_v5, %v6751_v49 }
 0x1a1   : > { %v3378_v36 = vpack.c.bf16 %v6736_v43, %v6734_v20  ;;  %v6756_v20 = vand.u32 4294901760, %v6755_v40  ;;  %v6758_v43 = vand.u32 4294901760, %v6757_v8  ;;  %v6782_v8 = vand.u32 4294901760, %v5472_v48  ;;  %v6787_v48 = vld [vmem:[#allocation76_spill] sm:$0xff] }
 0x1a2   : > { %3371 = vmatpush1.bf16.msra.mxu0 %v3370_v13  ;;  %v3380_v15 = vpack.c.bf16 %v6740_v45, %v6738_v32  ;;  %v6764_v45 = vand.u32 4294901760, %v6763_v16 }
 0x1a3   : > { %3755 = vmatpush1.bf16.msra.mxu1 %v3370_v13  ;;  %3373 = vmatprep.subr.bf16.mxu0 %v3372_v18  ;;  %v6742_v13 = vand.u32 4294901760, %v6741_v39  ;;  %v6765_v39 = vld [vmem:[#allocation104_spill] sm:$0xff] }
 0x1a4   : > { %3757 = vmatprep.subr.bf16.mxu1 %v3372_v18  ;;  %v6746_v18 = vld [vmem:[#allocation39_spill] sm:$0xff] }
 0x1a5   : > { %v3382_v14 = vpack.c.bf16 %v6744_v42, %v6742_v13  ;;  %v6747_v2 = vand.u32 4294901760, %v6746_v18  ;;  %v6766_v13 = vand.u32 4294901760, %v6765_v39  ;;  %v6768_v42 = vand.u32 4294901760, %v6767_v4 }
 0x1a6   : > { %3375 = vmatpush1.bf16.msra.mxu0 %v3374_v30 }
 0x1a7   : > { %3759 = vmatpush1.bf16.msra.mxu1 %v3374_v30  ;;  %3377 = vmatprep.subr.bf16.mxu0 %v3376_v37  ;;  %v3384_v23 = vpack.c.bf16 %v6747_v2, %v6745_v47  ;;  %v6750_v30 = vand.u32 4294901760, %v6749_v3  ;;  %v6769_v47 = vld [vmem:[#allocation106_spill] sm:$0xff]  ;;  %v6771_v2 = vld [vmem:[#allocation107_spill] sm:$0xff] }
 0x1a8   : > { %3761 = vmatprep.subr.bf16.mxu1 %v3376_v37  ;;  %v6754_v37 = vand.u32 4294901760, %v6753_v53  ;;  %v6770_v18 = vand.u32 4294901760, %v6769_v47  ;;  %v6773_v3 = vld [vmem:[#allocation63_spill] sm:$0xff]  ;;  %v6778_v53 = vld [vmem:[#allocation108_spill] sm:$0xff] }
 0x1a9   : > { %v3386_v60 = vpack.c.bf16 %v6750_v30, %v6748_v12  ;;  %v6774_v30 = vand.u32 4294901760, %v6773_v3 }
 0x1aa   : > { %3379 = vmatpush1.bf16.msra.mxu0 %v3378_v36  ;;  %v3390_v46 = vpack.c.bf16 %v6756_v20, %v6754_v37  ;;  %v6779_v37 = vand.u32 4294901760, %v6778_v53  ;;  %v6780_v20 = vld [vmem:[#allocation109_spill] sm:$0xff] }
 0x1ab   : > { %3763 = vmatpush1.bf16.msra.mxu1 %v3378_v36  ;;  %3381 = vmatprep.subr.bf16.mxu0 %v3380_v15  ;;  %v6759_v36 = vld [vmem:[#allocation52_spill] sm:$0xff] }
 0x1ac   : > { %3765 = vmatprep.subr.bf16.mxu1 %v3380_v15  ;;  %v6760_v58 = vand.u32 4294901760, %v6759_v36  ;;  %v3394_v15 = vpack.c.bf16 %v6764_v45, %v6762_v24  ;;  %v6783_v36 = vand.u32 4294901760, %v5498_v21  ;;  %v6788_v21 = vld [vmem:[#allocation77_spill] sm:$0xff] }
 0x1ae   : > { %3383 = vmatpush1.bf16.msra.mxu0 %v3382_v14  ;;  %v3392_v32 = vpack.c.bf16 %v6760_v58, %v6758_v43  ;;  %v6784_v58 = vand.u32 4294901760, %v5524_v0  ;;  %v6785_v0 = vld [vmem:[#allocation67_spill] sm:$0xff] }
 0x1af   : > { %3767 = vmatpush1.bf16.msra.mxu1 %v3382_v14  ;;  %3385 = vmatprep.subr.bf16.mxu0 %v3384_v23  ;;  %v3396_v14 = vpack.c.bf16 %v6768_v42, %v6766_v13 }
 0x1b0   : > { %3769 = vmatprep.subr.bf16.mxu1 %v3384_v23  ;;  %v6772_v23 = vand.u32 4294901760, %v6771_v2 }
 0x1b2   : > { %3387 = vmatpush1.bf16.msra.mxu0 %v3386_v60  ;;  %v3398_v12 = vpack.c.bf16 %v6772_v23, %v6770_v18 }
 0x1b3   : > { %3771 = vmatpush1.bf16.msra.mxu1 %v3386_v60  ;;  %3389 = vmatprep.subr.bf16.mxu0 %v3388_v38  ;;  %v6775_v60 = vld [vmem:[#allocation64_spill] sm:$0xff] }
 0x1b4   : > { %3773 = vmatprep.subr.bf16.mxu1 %v3388_v38  ;;  %v6776_v49 = vand.u32 4294901760, %v6775_v60  ;;  %v6777_v38 = vand.u32 4294901760, %v5441_v28  ;;  %v6786_v28 = vld [vmem:[#allocation75_spill] sm:$0xff] }
 0x1b6   : > { %3391 = vmatpush1.bf16.msra.mxu0 %v3390_v46  ;;  %v3400_v5 = vpack.c.bf16 %v6776_v49, %v6774_v30  ;;  %v3402_v40 = vpack.c.bf16 %v6779_v37, %v6777_v38  ;;  %v4116_v49 = vmov 1966171168   ;;  %v2931_v38 = vlaneseq }
 0x1b7   : > { %3775 = vmatpush1.bf16.msra.mxu1 %v3390_v46  ;;  %3393 = vmatprep.subr.bf16.mxu0 %v3392_v32  ;;  %v6781_v46 = vand.u32 4294901760, %v6780_v20 }
 0x1b8   : > { %3777 = vmatprep.subr.bf16.mxu1 %v3392_v32  ;;  %v3406_v32 = vpack.c.bf16 %v6784_v58, %v6783_v36  ;;  %vm2945_vm4 = vcmp.lt.s32.totalorder %v2931_v38, 256 }
 0x1b9   : > { %v3404_v43 = vpack.c.bf16 %v6782_v8, %v6781_v46  ;;  %v2932_v8 = vshrl.u32 %v2931_v38, 7 }
 0x1ba   : > { %3395 = vmatpush1.bf16.msra.mxu0 %v3394_v15 }
 0x1bb   : > { %3779 = vmatpush1.bf16.msra.mxu1 %v3394_v15  ;;  %3397 = vmatprep.subr.bf16.mxu0 %v3396_v14 }
 0x1bc   : > { %3781 = vmatprep.subr.bf16.mxu1 %v3396_v14 }
 0x1be   : > { %3399 = vmatpush1.bf16.msra.mxu0 %v3398_v12 }
 0x1bf   : > { %3783 = vmatpush1.bf16.msra.mxu1 %v3398_v12  ;;  %3401 = vmatprep.subr.bf16.mxu0 %v3400_v5 }
 0x1c0   : > { %3785 = vmatprep.subr.bf16.mxu1 %v3400_v5  ;;  %v2929_v5 = vunpack.c.l.s4 %v4116_v49 }
 0x1c2   : > { %3403 = vmatpush1.bf16.msra.mxu0 %v3402_v40  ;;  %v2930_v46 = vunpack.c.0.s8 %v2929_v5 }
 0x1c3   : > { %3787 = vmatpush1.bf16.msra.mxu1 %v3402_v40  ;;  %3405 = vmatprep.subr.bf16.mxu0 %v3404_v43 }
 0x1c4   : > { %3789 = vmatprep.subr.bf16.mxu1 %v3404_v43 }
 0x1c6   : > { %3407 = vmatpush1.bf16.msra.mxu0 %v3406_v32 }
 0x1c7   : > { %3791 = vmatpush1.bf16.msra.mxu1 %v3406_v32  ;;  %3409 = vmatprep.subr.bf16.mxu0 %v6643_v29 }
 0x1c8   : > { %3793 = vmatprep.subr.bf16.mxu1 %v6643_v29  ;;  %v6789_v29 = vld [vmem:[#allocation78_spill] sm:$0xff] }
 0x1c9   : > { %1448 = vmatmul.mubr.f32.vlgmr.msra.gmra.mrb[0].mxu0 %v6635_v41 }
 0x1ca   : > { %2734 = vmatmul.mubr.f32.vlgmr.msra.gmra.mrb[0].mxu1 %v6636_v10  ;;  %3411 = vmatpush1.bf16.msra.mxu0 %v6646_v59 }
 0x1cb   : > { %3795 = vmatpush1.bf16.msra.mxu1 %v6646_v59  ;;  %3413 = vmatprep.subr.bf16.mxu0 %v6647_v31  ;;  %v6790_v59 = vld [vmem:[#allocation79_spill] sm:$0xff] }
 0x1cc   : > { %3797 = vmatprep.subr.bf16.mxu1 %v6647_v31  ;;  %1583 = vmatprep.mubr.f32.mxu0 %v6691_v62  ;;  %v6791_v31 = vld [vmem:[#allocation80_spill] sm:$0xff] }
 0x1cd   : > { %2869 = vmatprep.mubr.f32.mxu1 %v6692_v25  ;;  %v3946_v25 = vld [vmem:[%s4314_s7 + $0x8] sm:$0xff] }
 0x1ce   : > { %3415 = vmatpush1.bf16.msra.mxu0 %v6650_v50 }
 0x1cf   : > { %3799 = vmatpush1.bf16.msra.mxu1 %v6650_v50  ;;  %3417 = vmatprep.subr.bf16.mxu0 %v6651_v51 }
 0x1d0   : > { %3801 = vmatprep.subr.bf16.mxu1 %v6651_v51 }
 0x1d2   : > { %3419 = vmatpush1.bf16.msra.mxu0 %v6652_v57 }
 0x1d3   : > { %3803 = vmatpush1.bf16.msra.mxu1 %v6652_v57  ;;  %3421 = vmatprep.subr.bf16.mxu0 %v6653_v56 }
 0x1d4   : > { %3805 = vmatprep.subr.bf16.mxu1 %v6653_v56 }
 0x1d6   : > { %3423 = vmatpush1.bf16.msra.mxu0 %v6654_v63 }
 0x1d7   : > { %3807 = vmatpush1.bf16.msra.mxu1 %v6654_v63  ;;  %3425 = vmatprep.subr.bf16.mxu0 %v6655_v1 }
 0x1d8   : > { %3809 = vmatprep.subr.bf16.mxu1 %v6655_v1 }
 0x1da   : > { %3427 = vmatpush1.bf16.msra.mxu0 %v6656_v44 }
 0x1db   : > { %3811 = vmatpush1.bf16.msra.mxu1 %v6656_v44  ;;  %3429 = vmatprep.subr.bf16.mxu0 %v6657_v6 }
 0x1dc   : > { %3813 = vmatprep.subr.bf16.mxu1 %v6657_v6 }
 0x1de   : > { %3431 = vmatpush1.bf16.msra.mxu0 %v6658_v11 }
 0x1df   : > { %3815 = vmatpush1.bf16.msra.mxu1 %v6658_v11  ;;  %3433 = vmatprep.subr.bf16.mxu0 %v6659_v55 }
 0x1e0   : > { %3817 = vmatprep.subr.bf16.mxu1 %v6659_v55 }
 0x1e2   : > { %3435 = vmatpush1.bf16.msra.mxu0 %v6660_v9 }
 0x1e3   : > { %3819 = vmatpush1.bf16.msra.mxu1 %v6660_v9  ;;  %3437 = vmatprep.subr.bf16.mxu0 %v6661_v35 }
 0x1e4   : > { %3821 = vmatprep.subr.bf16.mxu1 %v6661_v35 }
 0x1e6   : > { %3439 = vmatpush1.bf16.msra.mxu0 %v6662_v17 }
 0x1e7   : > { %3823 = vmatpush1.bf16.msra.mxu1 %v6662_v17  ;;  %3441 = vmatprep.subr.bf16.mxu0 %v6663_v54 }
 0x1e8   : > { %3825 = vmatprep.subr.bf16.mxu1 %v6663_v54 }
 0x1ea   : > { %3443 = vmatpush1.bf16.msra.mxu0 %v6664_v26 }
 0x1eb   : > { %3827 = vmatpush1.bf16.msra.mxu1 %v6664_v26  ;;  %3445 = vmatprep.subr.bf16.mxu0 %v6665_v19 }
 0x1ec   : > { %3829 = vmatprep.subr.bf16.mxu1 %v6665_v19  ;;  %v242_v19 = vld [vmem:[%s4307_s25 + $0x8] sm:$0xff] }
 0x1ed   : > { %v2908_v7 = vsub.f32 %v242_v19, %v3946_v25 }
 0x1ee   : > { %3447 = vmatpush1.bf16.msra.mxu0 %v6666_v34 }
 0x1ef   : > { %3831 = vmatpush1.bf16.msra.mxu1 %v6666_v34  ;;  %3449 = vmatprep.subr.bf16.mxu0 %v6667_v52  ;;  %v2910_v42 = vand.u32 2147483647, %v2908_v7 }
 0x1f0   : > { %3833 = vmatprep.subr.bf16.mxu1 %v6667_v52  ;;  %v3945_v52 = vld [vmem:[%s4314_s7] sm:$0xff] }
 0x1f2   : > { %3451 = vmatpush1.bf16.msra.mxu0 %v6668_v22 }
 0x1f3   : > { %3835 = vmatpush1.bf16.msra.mxu1 %v6668_v22  ;;  %3453 = vmatprep.subr.bf16.mxu0 %v6669_v33 }
 0x1f4   : > { %3837 = vmatprep.subr.bf16.mxu1 %v6669_v33 }
 0x1f6   : > { %3455 = vmatpush1.bf16.msra.mxu0 %v6670_v27 }
 0x1f7   : > { %3839 = vmatpush1.bf16.msra.mxu1 %v6670_v27  ;;  %3457 = vmatprep.subr.bf16.mxu0 %v6785_v0 }
 0x1f8   : > { %3841 = vmatprep.subr.bf16.mxu1 %v6785_v0  ;;  %v2933_v0 = vsub.s32 %v2930_v46, %v2932_v8 }
 0x1fa   : > { %3459 = vmatpush1.bf16.msra.mxu0 %v6786_v28 }
 0x1fb   : > { %3843 = vmatpush1.bf16.msra.mxu1 %v6786_v28  ;;  %3461 = vmatprep.subr.bf16.mxu0 %v6787_v48 }
 0x1fc   : > { %3845 = vmatprep.subr.bf16.mxu1 %v6787_v48 }
 0x1fe   : > { %3463 = vmatpush1.bf16.msra.mxu0 %v6788_v21 }
 0x1ff   : > { %3847 = vmatpush1.bf16.msra.mxu1 %v6788_v21  ;;  %3465 = vmatprep.subr.bf16.mxu0 %v6789_v29 }
 0x200   : > { %3849 = vmatprep.subr.bf16.mxu1 %v6789_v29 }
 0x202   : > { %3467 = vmatpush1.bf16.msra.mxu0 %v6790_v59 }
 0x203   : > { %3851 = vmatpush1.bf16.msra.mxu1 %v6790_v59  ;;  %3469 = vmatprep.subr.bf16.mxu0 %v6791_v31 }
 0x204   : > { %3853 = vmatprep.subr.bf16.mxu1 %v6791_v31 }
 0x206   : > { %3471 = vmatpush1.bf16.msra.mxu0 %v6680_v61 }
 0x207   : > { %3855 = vmatpush1.bf16.msra.mxu1 %v6680_v61 }
 0x209   : > { %1585 = vmatmul.mubr.f32.vlgmr.msra.gmra.mrb[0].mxu0 %v6635_v41  ;;  %v241_v41 = vld [vmem:[%s4307_s25] sm:$0xff] }
 0x20a   : > { %2871 = vmatmul.mubr.f32.vlgmr.msra.gmra.mrb[0].mxu1 %v6636_v10  ;;  %v2907_v22 = vsub.f32 %v241_v41, %v3945_v52 }
 0x20c   : > { %v2909_v13 = vand.u32 2147483647, %v2907_v22 }
 0x2dc   : > { %v1586_v50 = vpop.f32.mrb[0].mxu0 }
 0x2dd   : > { %v2872_v51 = vpop.f32.mrb[0].mxu1  ;;  %v2877_v57 = vmul.f32 0.008264462, %v1586_v50  ;;  %v1588_v56 = vpop.f32.mrb[1].mxu0 }
 0x2de   : > { %v2874_v63 = vpop.f32.mrb[1].mxu1  ;;  %v2878_v1 = vmul.f32 0.008264462, %v1588_v56  ;;  %v2879_v6 = vmul.f32 0.008264462, %v2872_v51 }
 0x2df   : > { %v2881_v44 = vmul.f32 %v2877_v57, %v2877_v57  ;;  %v2880_v55 = vmul.f32 0.008264462, %v2874_v63 }
 0x2e0   : > { %v2882_v11 = vmul.f32 %v2878_v1, %v2878_v1 }
 0x2e1   : > { %v2883_v9 = vsub.f32 %v2879_v6, %v2881_v44 }
 0x2e2   : > { %v2884_v35 = vsub.f32 %v2880_v55, %v2882_v11 }
 0x2e3   : > { %v2885_v17 = vmax.f32 %v2883_v9, 0.0 }
 0x2e4   : > { %v2886_v54 = vmax.f32 %v2884_v35, 0.0 }
 0x2e5   : > { %3941 = vrsqrt.f32 %v2885_v17  ;;  %vm2889_vm0 = vcmp.eq.f32.partialorder %v2885_v17, inf  ;;  %v2892_v33 = vand.u32 2147483648, %v2885_v17  ;;  %vm2891_vm1 = vcmp.eq.f32.partialorder %v2885_v17, 0.0 }
 0x2e6   : > { %3943 = vrsqrt.f32 %v2886_v54  ;;  %vm2896_vm2 = vcmp.eq.f32.partialorder %v2886_v54, inf  ;;  %v2899_v62 = vand.u32 2147483648, %v2886_v54  ;;  %vm2898_vm3 = vcmp.eq.f32.partialorder %v2886_v54, 0.0 }
 0x2ef   : > { %v3942_v10 = vpop.eup %3941 }
 0x2f0   : > { %v3944_v26 = vpop.eup %3943  ;;  %v2888_v34 = vmul.f32 %v3942_v10, %v2885_v17 }
 0x2f1   : > { %v2895_v27 = vmul.f32 %v3944_v26, %v2886_v54 }
 0x2f2   : > { %v2890_v61 = vsel %vm2889_vm0, %v2885_v17, %v2888_v34 }
 0x2f3   : > { %v2893_v24 = vsel %vm2891_vm1, %v2892_v33, %v2890_v61  ;;  %v2897_v16 = vsel %vm2896_vm2, %v2886_v54, %v2895_v27 }
 0x2f4   : > { %v2901_v45 = vmin.f32 %v2893_v24, 0.4  ;;  %v2900_v15 = vsel %vm2898_vm3, %v2899_v62, %v2897_v16 }
 0x2f5   : > { %v2902_v39 = vmin.f32 %v2900_v15, 0.4 }
 0x2f6   : > { %v2903_v4 = vmul.f32 5.0, %v2901_v45 }
 0x2f7   : > { %v2904_v14 = vmul.f32 5.0, %v2902_v39 }
 0x2f8   : > { %v2905_v47 = vadd.f32 1.0, %v2903_v4 }
 0x2f9   : > { %v2906_v18 = vadd.f32 1.0, %v2904_v14 }
 0x2fa   : > { %v2911_v2 = vmul.f32 %v2909_v13, %v2905_v47 }
 0x2fb   : > { %v2912_v23 = vmul.f32 %v2910_v42, %v2906_v18 }
 0x2fc   : > { %v2913_v12 = vrot.slane %v2911_v2, 4 }
 0x2fd   : > { %v2919_v3 = vrot.slane %v2912_v23, 4 }
 0x2fe   : > { %v2914_v30 = vadd.f32 %v2913_v12, %v2911_v2 }
 0x2ff   : > { %v2920_v60 = vadd.f32 %v2919_v3, %v2912_v23 }
 0x300   : > { %v2915_v53 = vrot.slane %v2914_v30, 2 }
 0x301   : > { %v2921_v37 = vrot.slane %v2920_v60, 2 }
 0x302   : > { %v2916_v40 = vadd.f32 %v2915_v53, %v2914_v30 }
 0x303   : > { %v2922_v20 = vadd.f32 %v2921_v37, %v2920_v60 }
 0x304   : > { %v2917_v43 = vrot.slane %v2916_v40, 1 }
 0x305   : > { %v2923_v36 = vrot.slane %v2922_v20, 1 }
 0x306   : > { %v2918_v58 = vadd.f32 %v2917_v43, %v2916_v40 }
 0x307   : > { %v2924_v32 = vadd.f32 %v2923_v36, %v2922_v20 }
 0x309   : > { %v2927_v28 = vcombine.low %v2918_v58, %v2924_v32 }
 0x30b   : > { %v2934_v48 = vrot.slane %v2927_v28, %v2933_v0 }
 0x30d   : > { %v2941_v21 = vrot.slane %v2934_v48, %v2933_v0 }
 0x30f   : > { %2947 = vst.msk [vmem:[%s238_s23] sm:$0x3] %vm2945_vm4, %v2941_v21 }
 0x310   : > { %4048 = shalt.err (!%p4045_p1)
}
 0x311   : > { %s4049_s9 = scalar_lea.hbm %s5975_s6, 32  ;;  %s4053_s25 = scalar_lea.hbm %s6022_s3, 64 }
 0x312   : > { %p4050_p6 = scmp.ne.s32.totalorder %s5975_s6, %s4049_s9  ;;  %p4054_p12 = scmp.lt.u32.totalorder %s5975_s6, %s6022_s3 }
 0x313   : > { %p4055_p11 = scmp.lt.u32.totalorder %s4053_s25, %s4049_s9  ;;  %p4057_p10 = scmp.lt.u32.totalorder %s4049_s9, %s5975_s6 }
 0x314   : > { %p4051_p8 = pnand %p4050_p6, %p6792_p13 }
 0x315   : > { %p4056_p0 = por %p4055_p11, %p4054_p12 }
 0x316   : > { %p4052_p4 = pneg %p4051_p8 }
 0x317   : > { %p4058_p3 = por %p4057_p10, %p4056_p0 }
 0x319   : > { %p4059_p7 = pnand %p4058_p3, %p4052_p4 }
 0x31b   : > { %4062 = shalt.err (!%p4059_p7)
}
 0x31c   : > { %3884 = dma.vmem_to_hbm [thread:$0]  (%p6792_p13), %s5977_s27, 32, %s5975_s6, %s2949_s29  }
 0x31d PF: > { %s2975_s7 = sand.u32 1, %s4097_s12   ;;  %p6793_p9 = scmp.ne.s32.totalorder %s6300_s19, 0 }
 0x31e   : > { %p6794_p2 = scmp.ge.s32.totalorder %s4109_s15, 2  ;;  %s2976_s18 = scalar_lea.sflag [#allocation4], %s2975_s7 }
 0x320   : > { %p3898_p5 = pnand %p6794_p2, %p6793_p9 }
 0x322   : > { %4092 = dma.done.wait (!%p3898_p5), %s2976_s18, 32  }
 0x323   : > { %4094 = vsyncadd (!%p3898_p5), %s2976_s18, 4294967264  ;;  %p19_p1 = scmp.ge.s32.totalorder %s4194_s24, 4   ;;  %s6795_s12 = smov %s4101_s13 }
 0x324   : > { %s6796_s13 = smov %s4105_s14  ;;  %s6797_s14 = smov %s4225_s17 }
 0x325   : > { %s6798_s15 = smov %s4194_s24  ;;  %21 = sbr.rel (!%p19_p1) target bundleno = 7 (0x7), region = 94 }
 0x32c   :  { %2981 = vsyncpa [#allocation3], 1 }
 0x32d   :  { %2983 = vsyncpa [#allocation3 + $0x1], 1 }
 0x32e   :  { %2984 = vsyncpa [#allocation6], 1 }
 0x32f   :  { %2986 = vsyncpa [#allocation6 + $0x1], 1 }
 0x330   :  { %2987 = vsyncpa [#allocation4], 1 }
 0x331   :  { %2989 = vsyncpa [#allocation4 + $0x1], 1 }

</bundles_post_ra>
